<compile_context>
chip_gen: v7x
topology: tpu7x:2x2x1
jax: 0.10.0
libtpu: 0.0.40
codegen_flags: <defaults>
</compile_context>

<pallas_src>
import functools

import jax
import jax.numpy as jnp
import numpy as np
from jax.experimental import pallas as pl
from jax.experimental.pallas import tpu as pltpu


def _loss_kernel(w_ref,                          # SMEM [8] f32: weights + n_mel
                 sp_ref, oh_ref, pm_ref,         # resident VMEM (speaker/one-hot/post-mult)
                 prp_ref, prt_ref, lens_ref,     # resident VMEM (packed prosody/lengths)
                 mp_ref, mt_ref,                 # pipelined (B, S, 128) mel tiles
                 tot_ref, spk_ref, post_ref, dur_ref, en_ref, pit_ref,
                 mel1_ref, mel2_ref,             # eight (1, 1) f32 outputs
                 l1_acc, l2_acc,                 # VMEM scratch (B, 128) lane-wide accumulators
                 *, last_tile_blocks):
    k = pl.program_id(0)
    nk = pl.num_programs(0)

    # ---- init accumulators on the first mel tile ----
    @pl.when(k == 0)
    def _init():
        l1_acc[...] = jnp.zeros_like(l1_acc)
        l2_acc[...] = jnp.zeros_like(l2_acc)

    # ---- HBM-bandwidth-dominant path: per-tile sublane reduce into lane-wide acc ----
    def _accumulate(valid_blocks):
        dm = mp_ref[...].astype(jnp.float32) - mt_ref[...].astype(jnp.float32)
        if valid_blocks is not None:
            # Mask garbage rows of a partial last tile (static Python branch:
            # full tiles never pay for the iota/compare/select).
            blk = jax.lax.broadcasted_iota(jnp.int32, dm.shape, 1)
            dm = jnp.where(blk < valid_blocks, dm, 0.0)
        l1_acc[...] += jnp.sum(jnp.abs(dm), axis=1)     # (B, 128)
        l2_acc[...] += jnp.sum(dm * dm, axis=1)         # (B, 128)

    if last_tile_blocks == 0:
        _accumulate(None)
    else:
        @pl.when(k < nk - 1)
        def _full_tiles():
            _accumulate(None)

        @pl.when(k == nk - 1)
        def _last_partial_tile():
            _accumulate(last_tile_blocks)

    # ---- finalize the small losses once, on the last tile ----
    @pl.when(k == nk - 1)
    def _finalize():
        spk_w, post_w = w_ref[0], w_ref[1]
        dur_w, en_w, pit_w, mel_w = w_ref[2], w_ref[3], w_ref[4], w_ref[5]
        n_mel = w_ref[6]

        # speaker cross-entropy (stable log-softmax), mean over batch
        logits = sp_ref[...].astype(jnp.float32)
        m = jnp.max(logits, axis=-1, keepdims=True)
        lse = m + jnp.log(jnp.sum(jnp.exp(logits - m), axis=-1, keepdims=True))
        ce = -jnp.sum(oh_ref[...] * (logits - lse), axis=-1, keepdims=True)    # (B,1)
        speaker_loss = spk_w * jnp.mean(ce, keepdims=True)                     # (1,1)

        # L2 norm of FiLM post-multipliers
        pmv = pm_ref[...].astype(jnp.float32)
        post_mult_loss = post_w * jnp.sqrt(jnp.sum(pmv * pmv, keepdims=True))  # (1,1)

        # reciprocals of the two denominators: computed once, reused
        il = lens_ref[0]                        # (B, 1) input lengths
        ol = lens_ref[1]                        # (B, 1) output lengths
        inv_il = pl.reciprocal(il)
        inv_mel = pl.reciprocal(n_mel * ol)

        def seq_mse(idx, wgt):
            d = prp_ref[idx].astype(jnp.float32) - prt_ref[idx].astype(jnp.float32)
            s = jnp.sum(d * d, axis=1, keepdims=True)          # (B,1)
            return wgt * jnp.mean(s * inv_il, keepdims=True)   # (1,1)

        duration_loss = seq_mse(0, dur_w)
        energy_loss = seq_mse(1, en_w)
        pitch_loss = seq_mse(2, pit_w)

        # single cross-lane XLU reduce of the lane-wide accumulators
        l1_row = jnp.sum(l1_acc[...], axis=1, keepdims=True)   # (B,1)
        l2_row = jnp.sum(l2_acc[...], axis=1, keepdims=True)   # (B,1)
        mel_l1 = mel_w * jnp.mean(l1_row * inv_mel, keepdims=True)
        mel_l2 = mel_w * jnp.mean(l2_row * inv_mel, keepdims=True)

        total = (speaker_loss + post_mult_loss + duration_loss + energy_loss
                 + pitch_loss + mel_l1 + mel_l2)

        tot_ref[...] = total
        spk_ref[...] = speaker_loss
        post_ref[...] = post_mult_loss
        dur_ref[...] = duration_loss
        en_ref[...] = energy_loss
        pit_ref[...] = pitch_loss
        mel1_ref[...] = mel_l1
        mel2_ref[...] = mel_l2


def update_adversarial_weight(iteration, warmup_steps, adv_max_weight):
    weight_iter = (iteration * warmup_steps ** (-1.5) * adv_max_weight
                   / warmup_steps ** (-0.5))
    return min(adv_max_weight, weight_iter)


def _resident(shape):
    """BlockSpec covering the whole (small) array, resident across the grid."""
    zeros = (0,) * len(shape)
    return pl.BlockSpec(shape, lambda k: zeros)


def _vmem_limit_bytes():
    """Generation-aware VMEM cap: ~3/4 of per-core physical VMEM
    (~48 MiB on v7x's 64 MiB, ~96 MiB on v5e/v6e's 128 MiB)."""
    try:
        cap = int(pltpu.get_tpu_info().vmem_capacity_bytes)
    except Exception:
        cap = 64 << 20      # conservative fallback, safe on every generation
    return (cap * 3) // 4


def daft_exprt_loss(outputs, targets, iteration, hparams, *,
                    max_tile_bytes=4 << 20, mel_buffers=2):
    """JAX/Pallas equivalent of DaftExprtLoss.forward (single-target form)."""
    speaker_preds, film_params, encoder_preds, decoder_preds, _ = outputs
    post_multipliers, _, _, _ = film_params
    duration_preds, energy_preds, pitch_preds, input_lengths = encoder_preds
    mel_spec_preds, output_lengths = decoder_preds
    (duration_targets, energy_targets, pitch_targets,
     mel_spec_targets, speaker_ids) = targets

    B, C, T = mel_spec_preds.shape
    M = C * T
    n_speakers = speaker_preds.shape[1]
    t_enc = duration_preds.shape[1]

    # --- small tensors: layout plumbing only ---
    onehot = jax.nn.one_hot(speaker_ids, n_speakers, dtype=jnp.float32)
    pm = post_multipliers.reshape(1, -1)
    prp = jnp.stack([duration_preds, energy_preds, pitch_preds], axis=0)        # (3,B,T_enc)
    prt = jnp.stack([duration_targets, energy_targets, pitch_targets], axis=0)  # (3,B,T_enc)
    lens = jnp.stack([input_lengths.astype(jnp.float32).reshape(B, 1),
                      output_lengths.astype(jnp.float32).reshape(B, 1)], axis=0)  # (2,B,1)

    # --- mel layout: lane-dense (B, M/128, 128); zero-pad up to a lane multiple.
    # Padding both pred and target with zeros makes the padded lanes contribute
    # exactly 0 to |d| and d^2, so no per-lane mask is needed in the kernel.
    mp = mel_spec_preds.reshape(B, M)
    mt = mel_spec_targets.reshape(B, M)
    m_pad = (-M) % 128
    if m_pad:
        mp = jnp.pad(mp, ((0, 0), (0, m_pad)))
        mt = jnp.pad(mt, ((0, 0), (0, m_pad)))
    m_blk = (M + m_pad) // 128
    mp = mp.reshape(B, m_blk, 128)
    mt = mt.reshape(B, m_blk, 128)

    speaker_weight = update_adversarial_weight(
        iteration, hparams['warmup_steps'], hparams['adv_max_weight'])
    w = jnp.array([speaker_weight,
                   hparams['post_mult_weight'],
                   hparams['dur_weight'],
                   hparams['energy_weight'],
                   hparams['pitch_weight'],
                   hparams['mel_spec_weight'],
                   float(hparams['n_mel_channels']),
                   0.0], dtype=jnp.float32)

    # --- mel tile selection from a byte budget under the generation-aware cap ---
    vmem_limit = _vmem_limit_bytes()
    itemsize = mel_spec_preds.dtype.itemsize
    reserve = 8 << 20                                   # residents + f32 temps headroom
    per_input_budget = max((vmem_limit - reserve) // (2 * mel_buffers), 1 << 20)
    tile_bytes = min(max_tile_bytes, per_input_budget)  # multi-MiB per input per step
    row_block_bytes = B * 128 * itemsize                # one 128-lane block across batch
    s_tile = max(8, (tile_bytes // row_block_bytes) // 8 * 8)   # multiple of 8 sublanes
    if s_tile >= m_blk:
        s_tile = m_blk                                  # full extent: always legal
    nk = pl.cdiv(m_blk, s_tile)
    last_tile_blocks = m_blk % s_tile                   # 0 == last tile is full

    def mel_spec():
        if mel_buffers == 2:
            return pl.BlockSpec((B, s_tile, 128), lambda k: (0, k, 0))
        # v7x knob: deeper pipeline if a profile shows exposed DMA.
        return pl.BlockSpec((B, s_tile, 128), lambda k: (0, k, 0),
                            pipeline_mode=pl.Buffered(mel_buffers))

    kernel = functools.partial(_loss_kernel, last_tile_blocks=last_tile_blocks)
    scalar_out = jax.ShapeDtypeStruct((1, 1), jnp.float32)

    outs = pl.pallas_call(
        kernel,
        grid=(nk,),
        out_shape=tuple(scalar_out for _ in range(8)),
        in_specs=[
            pl.BlockSpec(memory_space=pltpu.MemorySpace.SMEM),   # weights (scalars)
            _resident((B, n_speakers)),                          # speaker logits
            _resident((B, n_speakers)),                          # one-hot targets
            _resident((1, pm.shape[1])),                         # post multipliers
            _resident((3, B, t_enc)),                            # packed prosody preds
            _resident((3, B, t_enc)),                            # packed prosody targets
            _resident((2, B, 1)),                                # packed lengths [il; ol]
            mel_spec(),                                          # mel preds (pipelined)
            mel_spec(),                                          # mel targets (pipelined)
        ],
        out_specs=tuple(pl.BlockSpec((1, 1), lambda k: (0, 0)) for _ in range(8)),
        scratch_shapes=[pltpu.VMEM((B, 128), jnp.float32),
                        pltpu.VMEM((B, 128), jnp.float32)],
        compiler_params=pltpu.CompilerParams(
            dimension_semantics=("arbitrary",),
            vmem_limit_bytes=int(vmem_limit)),
    )(w, speaker_preds, onehot, pm, prp, prt, lens, mp, mt)

    total, spk, post, dur, en, pit, mel1, mel2 = outs
    loss = total[0, 0]
    # TODO(synk): PyTorch calls .item() on the individual losses (host sync);
    # here they are returned as device scalars.
    individual_loss = {
        'speaker_loss': spk[0, 0],
        'post_mult_loss': post[0, 0],
        'duration_loss': dur[0, 0],
        'energy_loss': en[0, 0],
        'pitch_loss': pit[0, 0],
        'mel_spec_l1_loss': mel1[0, 0],
        'mel_spec_l2_loss': mel2[0, 0],
    }
    return loss, individual_loss


def _reference_loss(outputs, targets, iteration, hparams):
    """Pure-JAX reference mirroring the PyTorch module, for correctness check."""
    speaker_preds, film_params, encoder_preds, decoder_preds, _ = outputs
    post_multipliers, _, _, _ = film_params
    duration_preds, energy_preds, pitch_preds, input_lengths = encoder_preds
    mel_spec_preds, output_lengths = decoder_preds
    (duration_targets, energy_targets, pitch_targets,
     mel_spec_targets, speaker_ids) = targets

    logp = jax.nn.log_softmax(speaker_preds.astype(jnp.float32), axis=-1)
    speaker_loss = -jnp.mean(jnp.take_along_axis(logp, speaker_ids[:, None], axis=1))
    post_mult_loss = jnp.linalg.norm(post_multipliers.astype(jnp.float32))
    il = input_lengths.astype(jnp.float32)
    ol = output_lengths.astype(jnp.float32)
    dur = jnp.mean(jnp.sum((duration_preds - duration_targets) ** 2, axis=1) / il)
    en = jnp.mean(jnp.sum((energy_preds - energy_targets) ** 2, axis=1) / il)
    pit = jnp.mean(jnp.sum((pitch_preds - pitch_targets) ** 2, axis=1) / il)
    C = hparams['n_mel_channels']
    dmel = mel_spec_preds.astype(jnp.float32) - mel_spec_targets.astype(jnp.float32)
    l1 = jnp.mean(jnp.sum(jnp.abs(dmel), axis=(1, 2)) / (C * ol))
    l2 = jnp.mean(jnp.sum(dmel ** 2, axis=(1, 2)) / (C * ol))

    sw = update_adversarial_weight(iteration, hparams['warmup_steps'],
                                   hparams['adv_max_weight'])
    individual = {
        'speaker_loss': sw * speaker_loss,
        'post_mult_loss': hparams['post_mult_weight'] * post_mult_loss,
        'duration_loss': hparams['dur_weight'] * dur,
        'energy_loss': hparams['energy_weight'] * en,
        'pitch_loss': hparams['pitch_weight'] * pit,
        'mel_spec_l1_loss': hparams['mel_spec_weight'] * l1,
        'mel_spec_l2_loss': hparams['mel_spec_weight'] * l2,
    }
    total = sum(individual.values())
    return total, individual


if __name__ == "__main__":
    hparams = {
        'n_mel_channels': 8,
        'warmup_steps': 4000,
        'adv_max_weight': 1e-2,
        'post_mult_weight': 1e-3,
        'dur_weight': 1.0,
        'energy_weight': 0.1,
        'pitch_weight': 0.1,
        'mel_spec_weight': 1.0,
    }
    iteration = 100

    def make_case(seed, B, n_speakers, T_enc, C, T_out, P):
        key = jax.random.PRNGKey(seed)
        ks = jax.random.split(key, 11)
        speaker_preds    = jax.random.normal(ks[0], (B, n_speakers), jnp.float32)
        post_multipliers = jax.random.normal(ks[1], (P,), jnp.float32) * 0.1
        duration_preds   = jax.random.normal(ks[2], (B, T_enc), jnp.float32)
        energy_preds     = jax.random.normal(ks[3], (B, T_enc), jnp.float32)
        pitch_preds      = jax.random.normal(ks[4], (B, T_enc), jnp.float32)
        mel_spec_preds   = jax.random.normal(ks[5], (B, C, T_out), jnp.float32)
        duration_targets = jax.random.normal(ks[6], (B, T_enc), jnp.float32)
        energy_targets   = jax.random.normal(ks[7], (B, T_enc), jnp.float32)
        pitch_targets    = jax.random.normal(ks[8], (B, T_enc), jnp.float32)
        mel_spec_targets = jax.random.normal(ks[9], (B, C, T_out), jnp.float32)
        speaker_ids      = jax.random.randint(ks[10], (B,), 0, n_speakers, jnp.int32)
        input_lengths  = jnp.array([float(T_enc - 3 * i) for i in range(B)], jnp.float32)
        output_lengths = jnp.array([float(T_out - 7 * i) for i in range(B)], jnp.float32)
        outputs = (
            speaker_preds,
            (post_multipliers, None, None, None),
            (duration_preds, energy_preds, pitch_preds, input_lengths),
            (mel_spec_preds, output_lengths),
            None,
        )
        targets = (duration_targets, energy_targets, pitch_targets,
                   mel_spec_targets, speaker_ids)
        return outputs, targets

    # Case 1: lane-aligned mel (M = 8*208 = 1664 = 13*128).  Tiny tile budget to
    # exercise the pipelined grid + masked partial last tile (S=8 -> 2 steps, rem=5).
    out1, tgt1 = make_case(0, B=2, n_speakers=8, T_enc=16, C=8, T_out=208, P=128)
    loss1, ind1 = daft_exprt_loss(out1, tgt1, iteration, hparams,
                                  max_tile_bytes=8 * 1024)
    loss1 = jax.block_until_ready(loss1)
    ref1_total, ref1_ind = _reference_loss(out1, tgt1, iteration, hparams)
    np.testing.assert_allclose(np.asarray(loss1), np.asarray(ref1_total),
                               rtol=1e-5, atol=1e-5)
    for name, val in ind1.items():
        np.testing.assert_allclose(np.asarray(val), np.asarray(ref1_ind[name]),
                                   rtol=1e-5, atol=1e-6, err_msg=name)

    # Case 2: non-lane-aligned mel (M = 8*100 = 800 -> zero-padded to 896);
    # default byte-budget tiling collapses to a single resident tile (no mask).
    out2, tgt2 = make_case(1, B=2, n_speakers=8, T_enc=16, C=8, T_out=100, P=128)
    loss2, ind2 = daft_exprt_loss(out2, tgt2, iteration, hparams)
    loss2 = jax.block_until_ready(loss2)
    ref2_total, ref2_ind = _reference_loss(out2, tgt2, iteration, hparams)
    np.testing.assert_allclose(np.asarray(loss2), np.asarray(ref2_total),
                               rtol=1e-5, atol=1e-5)
    for name, val in ind2.items():
        np.testing.assert_allclose(np.asarray(val), np.asarray(ref2_ind[name]),
                                   rtol=1e-5, atol=1e-6, err_msg=name)

    print("KERNEL_OK")
</pallas_src>

<mosaic_0001>
module attributes {stable_mosaic.version = 11 : i64} {
  func.func @_loss_kernel(%arg0: i32, %arg1: memref<8xf32, #tpu.memory_space<smem>>, %arg2: memref<2x8xf32, #tpu.memory_space<vmem>>, %arg3: memref<2x8xf32, #tpu.memory_space<vmem>>, %arg4: memref<1x128xf32, #tpu.memory_space<vmem>>, %arg5: memref<3x2x16xf32, #tpu.memory_space<vmem>>, %arg6: memref<3x2x16xf32, #tpu.memory_space<vmem>>, %arg7: memref<2x2x1xf32, #tpu.memory_space<vmem>>, %arg8: memref<2x8x128xf32, #tpu.memory_space<vmem>>, %arg9: memref<2x8x128xf32, #tpu.memory_space<vmem>>, %arg10: memref<1x1xf32, #tpu.memory_space<vmem>>, %arg11: memref<1x1xf32, #tpu.memory_space<vmem>>, %arg12: memref<1x1xf32, #tpu.memory_space<vmem>>, %arg13: memref<1x1xf32, #tpu.memory_space<vmem>>, %arg14: memref<1x1xf32, #tpu.memory_space<vmem>>, %arg15: memref<1x1xf32, #tpu.memory_space<vmem>>, %arg16: memref<1x1xf32, #tpu.memory_space<vmem>>, %arg17: memref<1x1xf32, #tpu.memory_space<vmem>>, %arg18: memref<2x128xf32, #tpu.memory_space<vmem>>, %arg19: memref<2x128xf32, #tpu.memory_space<vmem>>) attributes {dimension_semantics = [#tpu.dimension_semantics<arbitrary>], iteration_bounds = array<i64: 2>, scalar_prefetch = 0 : i64, scratch_operands = 2 : i64, tpu.core_type = #tpu.core_type<tc>, window_params = [{transform_indices = @transform_0, window_bounds = array<i64: 8>}, {pipeline_mode = #tpu.pipeline_mode<synchronous>, transform_indices = @transform_1, window_bounds = array<i64: 2, 8>}, {pipeline_mode = #tpu.pipeline_mode<synchronous>, transform_indices = @transform_2, window_bounds = array<i64: 2, 8>}, {pipeline_mode = #tpu.pipeline_mode<synchronous>, transform_indices = @transform_3, window_bounds = array<i64: 1, 128>}, {pipeline_mode = #tpu.pipeline_mode<synchronous>, transform_indices = @transform_4, window_bounds = array<i64: 3, 2, 16>}, {pipeline_mode = #tpu.pipeline_mode<synchronous>, transform_indices = @transform_5, window_bounds = array<i64: 3, 2, 16>}, {pipeline_mode = #tpu.pipeline_mode<synchronous>, transform_indices = @transform_6, window_bounds = array<i64: 2, 2, 1>}, {transform_indices = @transform_7, window_bounds = array<i64: 2, 8, 128>}, {transform_indices = @transform_8, window_bounds = array<i64: 2, 8, 128>}, {pipeline_mode = #tpu.pipeline_mode<synchronous>, transform_indices = @transform_9, window_bounds = array<i64: 1, 1>}, {pipeline_mode = #tpu.pipeline_mode<synchronous>, transform_indices = @transform_10, window_bounds = array<i64: 1, 1>}, {pipeline_mode = #tpu.pipeline_mode<synchronous>, transform_indices = @transform_11, window_bounds = array<i64: 1, 1>}, {pipeline_mode = #tpu.pipeline_mode<synchronous>, transform_indices = @transform_12, window_bounds = array<i64: 1, 1>}, {pipeline_mode = #tpu.pipeline_mode<synchronous>, transform_indices = @transform_13, window_bounds = array<i64: 1, 1>}, {pipeline_mode = #tpu.pipeline_mode<synchronous>, transform_indices = @transform_14, window_bounds = array<i64: 1, 1>}, {pipeline_mode = #tpu.pipeline_mode<synchronous>, transform_indices = @transform_15, window_bounds = array<i64: 1, 1>}, {pipeline_mode = #tpu.pipeline_mode<synchronous>, transform_indices = @transform_16, window_bounds = array<i64: 1, 1>}]} {
    %c0_i32 = arith.constant 0 : i32
    %0 = arith.cmpi eq, %arg0, %c0_i32 : i32
    %1 = arith.extui %0 : i1 to i32
    %c0_i32_0 = arith.constant 0 : i32
    %2 = arith.cmpi ne, %1, %c0_i32_0 : i32
    scf.if %2 {
      %cst = arith.constant 0.000000e+00 : f32
      %12 = vector.broadcast %cst : f32 to vector<2x128xf32>
      %c0 = arith.constant 0 : index
      %c0_6 = arith.constant 0 : index
      %13 = vector.load %arg18[%c0, %c0_6] : memref<2x128xf32, #tpu.memory_space<vmem>>, vector<2x128xf32>
      tpu.vector_store %arg18[%c0, %c0_6], %12 {strides = array<i32>} : memref<2x128xf32, #tpu.memory_space<vmem>>, vector<2x128xf32>,
      %cst_7 = arith.constant 0.000000e+00 : f32
      %14 = vector.broadcast %cst_7 : f32 to vector<2x128xf32>
      %c0_8 = arith.constant 0 : index
      %c0_9 = arith.constant 0 : index
      %15 = vector.load %arg19[%c0_8, %c0_9] : memref<2x128xf32, #tpu.memory_space<vmem>>, vector<2x128xf32>
      tpu.vector_store %arg19[%c0_8, %c0_9], %14 {strides = array<i32>} : memref<2x128xf32, #tpu.memory_space<vmem>>, vector<2x128xf32>,
    } else {
    }
    %c1_i32 = arith.constant 1 : i32
    %3 = arith.cmpi slt, %arg0, %c1_i32 : i32
    %4 = arith.extui %3 : i1 to i32
    %c0_i32_1 = arith.constant 0 : i32
    %5 = arith.cmpi ne, %4, %c0_i32_1 : i32
    scf.if %5 {
      %c0 = arith.constant 0 : index
      %c0_6 = arith.constant 0 : index
      %c0_7 = arith.constant 0 : index
      %12 = vector.load %arg8[%c0, %c0_6, %c0_7] : memref<2x8x128xf32, #tpu.memory_space<vmem>>, vector<2x8x128xf32>
      %c0_8 = arith.constant 0 : index
      %c0_9 = arith.constant 0 : index
      %c0_10 = arith.constant 0 : index
      %13 = vector.load %arg9[%c0_8, %c0_9, %c0_10] : memref<2x8x128xf32, #tpu.memory_space<vmem>>, vector<2x8x128xf32>
      %14 = arith.subf %12, %13 : vector<2x8x128xf32>
      %c0_11 = arith.constant 0 : index
      %c0_12 = arith.constant 0 : index
      %15 = vector.load %arg18[%c0_11, %c0_12] : memref<2x128xf32, #tpu.memory_space<vmem>>, vector<2x128xf32>
      %16 = math.absf %14 : vector<2x8x128xf32>
      %cst = arith.constant dense<0.000000e+00> : vector<2x128xf32>
      %17 = vector.multi_reduction <add>, %16, %cst [1] : vector<2x8x128xf32> to vector<2x128xf32>
      %18 = arith.addf %15, %17 : vector<2x128xf32>
      %c0_13 = arith.constant 0 : index
      %c0_14 = arith.constant 0 : index
      %19 = vector.load %arg18[%c0_13, %c0_14] : memref<2x128xf32, #tpu.memory_space<vmem>>, vector<2x128xf32>
      tpu.vector_store %arg18[%c0_13, %c0_14], %18 {strides = array<i32>} : memref<2x128xf32, #tpu.memory_space<vmem>>, vector<2x128xf32>,
      %c0_15 = arith.constant 0 : index
      %c0_16 = arith.constant 0 : index
      %20 = vector.load %arg19[%c0_15, %c0_16] : memref<2x128xf32, #tpu.memory_space<vmem>>, vector<2x128xf32>
      %21 = arith.mulf %14, %14 : vector<2x8x128xf32>
      %cst_17 = arith.constant dense<0.000000e+00> : vector<2x128xf32>
      %22 = vector.multi_reduction <add>, %21, %cst_17 [1] : vector<2x8x128xf32> to vector<2x128xf32>
      %23 = arith.addf %20, %22 : vector<2x128xf32>
      %c0_18 = arith.constant 0 : index
      %c0_19 = arith.constant 0 : index
      %24 = vector.load %arg19[%c0_18, %c0_19] : memref<2x128xf32, #tpu.memory_space<vmem>>, vector<2x128xf32>
      tpu.vector_store %arg19[%c0_18, %c0_19], %23 {strides = array<i32>} : memref<2x128xf32, #tpu.memory_space<vmem>>, vector<2x128xf32>,
    } else {
    }
    %c1_i32_2 = arith.constant 1 : i32
    %6 = arith.cmpi eq, %arg0, %c1_i32_2 : i32
    %7 = arith.extui %6 : i1 to i32
    %c0_i32_3 = arith.constant 0 : i32
    %8 = arith.cmpi ne, %7, %c0_i32_3 : i32
    scf.if %8 {
      %c0 = arith.constant 0 : index
      %c0_6 = arith.constant 0 : index
      %c0_7 = arith.constant 0 : index
      %12 = vector.load %arg8[%c0, %c0_6, %c0_7] : memref<2x8x128xf32, #tpu.memory_space<vmem>>, vector<2x8x128xf32>
      %c0_8 = arith.constant 0 : index
      %c0_9 = arith.constant 0 : index
      %c0_10 = arith.constant 0 : index
      %13 = vector.load %arg9[%c0_8, %c0_9, %c0_10] : memref<2x8x128xf32, #tpu.memory_space<vmem>>, vector<2x8x128xf32>
      %14 = arith.subf %12, %13 : vector<2x8x128xf32>
      %15 = tpu.iota {dimensions = array<i32: 1>} : vector<2x8x128xi32>
      %c5_i32 = arith.constant 5 : i32
      %16 = vector.broadcast %c5_i32 : i32 to vector<2x8x128xi32>
      %17 = arith.cmpi slt, %15, %16 : vector<2x8x128xi32>
      %cst = arith.constant 0.000000e+00 : f32
      %18 = vector.broadcast %cst : f32 to vector<2x8x128xf32>
      %19 = arith.select %17, %14, %18 : vector<2x8x128xi1>, vector<2x8x128xf32>
      %c0_11 = arith.constant 0 : index
      %c0_12 = arith.constant 0 : index
      %20 = vector.load %arg18[%c0_11, %c0_12] : memref<2x128xf32, #tpu.memory_space<vmem>>, vector<2x128xf32>
      %21 = math.absf %19 : vector<2x8x128xf32>
      %cst_13 = arith.constant dense<0.000000e+00> : vector<2x128xf32>
      %22 = vector.multi_reduction <add>, %21, %cst_13 [1] : vector<2x8x128xf32> to vector<2x128xf32>
      %23 = arith.addf %20, %22 : vector<2x128xf32>
      %c0_14 = arith.constant 0 : index
      %c0_15 = arith.constant 0 : index
      %24 = vector.load %arg18[%c0_14, %c0_15] : memref<2x128xf32, #tpu.memory_space<vmem>>, vector<2x128xf32>
      tpu.vector_store %arg18[%c0_14, %c0_15], %23 {strides = array<i32>} : memref<2x128xf32, #tpu.memory_space<vmem>>, vector<2x128xf32>,
      %c0_16 = arith.constant 0 : index
      %c0_17 = arith.constant 0 : index
      %25 = vector.load %arg19[%c0_16, %c0_17] : memref<2x128xf32, #tpu.memory_space<vmem>>, vector<2x128xf32>
      %26 = arith.mulf %19, %19 : vector<2x8x128xf32>
      %cst_18 = arith.constant dense<0.000000e+00> : vector<2x128xf32>
      %27 = vector.multi_reduction <add>, %26, %cst_18 [1] : vector<2x8x128xf32> to vector<2x128xf32>
      %28 = arith.addf %25, %27 : vector<2x128xf32>
      %c0_19 = arith.constant 0 : index
      %c0_20 = arith.constant 0 : index
      %29 = vector.load %arg19[%c0_19, %c0_20] : memref<2x128xf32, #tpu.memory_space<vmem>>, vector<2x128xf32>
      tpu.vector_store %arg19[%c0_19, %c0_20], %28 {strides = array<i32>} : memref<2x128xf32, #tpu.memory_space<vmem>>, vector<2x128xf32>,
    } else {
    }
    %c1_i32_4 = arith.constant 1 : i32
    %9 = arith.cmpi eq, %arg0, %c1_i32_4 : i32
    %10 = arith.extui %9 : i1 to i32
    %c0_i32_5 = arith.constant 0 : i32
    %11 = arith.cmpi ne, %10, %c0_i32_5 : i32
    scf.if %11 {
      %c0 = arith.constant 0 : index
      %12 = memref.load %arg1[%c0] : memref<8xf32, #tpu.memory_space<smem>>
      %c1 = arith.constant 1 : index
      %13 = memref.load %arg1[%c1] : memref<8xf32, #tpu.memory_space<smem>>
      %c2 = arith.constant 2 : index
      %14 = memref.load %arg1[%c2] : memref<8xf32, #tpu.memory_space<smem>>
      %c3 = arith.constant 3 : index
      %15 = memref.load %arg1[%c3] : memref<8xf32, #tpu.memory_space<smem>>
      %c4 = arith.constant 4 : index
      %16 = memref.load %arg1[%c4] : memref<8xf32, #tpu.memory_space<smem>>
      %c5 = arith.constant 5 : index
      %17 = memref.load %arg1[%c5] : memref<8xf32, #tpu.memory_space<smem>>
      %c6 = arith.constant 6 : index
      %18 = memref.load %arg1[%c6] : memref<8xf32, #tpu.memory_space<smem>>
      %c0_6 = arith.constant 0 : index
      %c0_7 = arith.constant 0 : index
      %19 = vector.load %arg2[%c0_6, %c0_7] : memref<2x8xf32, #tpu.memory_space<vmem>>, vector<2x8xf32>
      %cst = arith.constant dense<0xFF800000> : vector<2xf32>
      %20 = vector.multi_reduction <maximumf>, %19, %cst [1] : vector<2x8xf32> to vector<2xf32>
      %21 = vector.shape_cast %20 : vector<2xf32> to vector<2x1xf32>
      %22 = vector.broadcast %21 : vector<2x1xf32> to vector<2x8xf32>
      %23 = arith.subf %19, %22 : vector<2x8xf32>
      %24 = math.exp %23 : vector<2x8xf32>
      %cst_8 = arith.constant dense<0.000000e+00> : vector<2xf32>
      %25 = vector.multi_reduction <add>, %24, %cst_8 [1] : vector<2x8xf32> to vector<2xf32>
      %26 = vector.shape_cast %25 : vector<2xf32> to vector<2x1xf32>
      %27 = math.log %26 : vector<2x1xf32>
      %28 = arith.addf %21, %27 : vector<2x1xf32>
      %c0_9 = arith.constant 0 : index
      %c0_10 = arith.constant 0 : index
      %29 = vector.load %arg3[%c0_9, %c0_10] : memref<2x8xf32, #tpu.memory_space<vmem>>, vector<2x8xf32>
      %30 = vector.broadcast %28 : vector<2x1xf32> to vector<2x8xf32>
      %31 = arith.subf %19, %30 : vector<2x8xf32>
      %32 = arith.mulf %29, %31 : vector<2x8xf32>
      %cst_11 = arith.constant dense<0.000000e+00> : vector<2xf32>
      %33 = vector.multi_reduction <add>, %32, %cst_11 [1] : vector<2x8xf32> to vector<2xf32>
      %34 = vector.shape_cast %33 : vector<2xf32> to vector<2x1xf32>
      %cst_12 = arith.constant 0.000000e+00 : f32
      %35 = vector.broadcast %cst_12 : f32 to vector<2x1xf32>
      %36 = arith.subf %35, %34 : vector<2x1xf32>
      %37 = vector.shape_cast %36 : vector<2x1xf32> to vector<1x2x1xf32>
      %cst_13 = arith.constant dense<0.000000e+00> : vector<1xf32>
      %38 = vector.multi_reduction <add>, %37, %cst_13 [1, 2] : vector<1x2x1xf32> to vector<1xf32>
      %39 = vector.shape_cast %38 : vector<1xf32> to vector<1x1x1xf32>
      %40 = vector.extract %39[0, 0, 0] : f32 from vector<1x1x1xf32>
      %41 = vector.broadcast %40 : f32 to vector<1x1xf32>
      %cst_14 = arith.constant 2.000000e+00 : f32
      %42 = vector.broadcast %cst_14 : f32 to vector<1x1xf32>
      %43 = arith.divf %41, %42 : vector<1x1xf32>
      %44 = vector.broadcast %12 : f32 to vector<1x1xf32>
      %45 = arith.mulf %44, %43 : vector<1x1xf32>
      %c0_15 = arith.constant 0 : index
      %c0_16 = arith.constant 0 : index
      %46 = vector.load %arg4[%c0_15, %c0_16] : memref<1x128xf32, #tpu.memory_space<vmem>>, vector<1x128xf32>
      %47 = arith.mulf %46, %46 : vector<1x128xf32>
      %48 = vector.shape_cast %47 : vector<1x128xf32> to vector<1x1x128xf32>
      %cst_17 = arith.constant dense<0.000000e+00> : vector<1xf32>
      %49 = vector.multi_reduction <add>, %48, %cst_17 [1, 2] : vector<1x1x128xf32> to vector<1xf32>
      %50 = vector.shape_cast %49 : vector<1xf32> to vector<1x1x1xf32>
      %51 = vector.extract %50[0, 0, 0] : f32 from vector<1x1x1xf32>
      %52 = vector.broadcast %51 : f32 to vector<1x1xf32>
      %53 = math.sqrt %52 : vector<1x1xf32>
      %54 = vector.broadcast %13 : f32 to vector<1x1xf32>
      %55 = arith.mulf %54, %53 : vector<1x1xf32>
      %c0_18 = arith.constant 0 : index
      %c0_19 = arith.constant 0 : index
      %c0_20 = arith.constant 0 : index
      %56 = vector.load %arg7[%c0_18, %c0_19, %c0_20] : memref<2x2x1xf32, #tpu.memory_space<vmem>>, vector<1x2x1xf32>
      %57 = vector.shape_cast %56 : vector<1x2x1xf32> to vector<2x1xf32>
      %c1_21 = arith.constant 1 : index
      %c0_22 = arith.constant 0 : index
      %c0_23 = arith.constant 0 : index
      %58 = vector.load %arg7[%c1_21, %c0_22, %c0_23] : memref<2x2x1xf32, #tpu.memory_space<vmem>>, vector<1x2x1xf32>
      %59 = vector.shape_cast %58 : vector<1x2x1xf32> to vector<2x1xf32>
      %60 = tpu.reciprocal %57 : vector<2x1xf32> -> vector<2x1xf32>
      %61 = vector.broadcast %18 : f32 to vector<2x1xf32>
      %62 = arith.mulf %61, %59 : vector<2x1xf32>
      %63 = tpu.reciprocal %62 : vector<2x1xf32> -> vector<2x1xf32>
      %c0_24 = arith.constant 0 : index
      %c0_25 = arith.constant 0 : index
      %c0_26 = arith.constant 0 : index
      %64 = vector.load %arg5[%c0_24, %c0_25, %c0_26] : memref<3x2x16xf32, #tpu.memory_space<vmem>>, vector<1x2x16xf32>
      %65 = vector.shape_cast %64 : vector<1x2x16xf32> to vector<2x16xf32>
      %c0_27 = arith.constant 0 : index
      %c0_28 = arith.constant 0 : index
      %c0_29 = arith.constant 0 : index
      %66 = vector.load %arg6[%c0_27, %c0_28, %c0_29] : memref<3x2x16xf32, #tpu.memory_space<vmem>>, vector<1x2x16xf32>
      %67 = vector.shape_cast %66 : vector<1x2x16xf32> to vector<2x16xf32>
      %68 = arith.subf %65, %67 : vector<2x16xf32>
      %69 = arith.mulf %68, %68 : vector<2x16xf32>
      %cst_30 = arith.constant dense<0.000000e+00> : vector<2xf32>
      %70 = vector.multi_reduction <add>, %69, %cst_30 [1] : vector<2x16xf32> to vector<2xf32>
      %71 = vector.shape_cast %70 : vector<2xf32> to vector<2x1xf32>
      %72 = arith.mulf %71, %60 : vector<2x1xf32>
      %73 = vector.shape_cast %72 : vector<2x1xf32> to vector<1x2x1xf32>
      %cst_31 = arith.constant dense<0.000000e+00> : vector<1xf32>
      %74 = vector.multi_reduction <add>, %73, %cst_31 [1, 2] : vector<1x2x1xf32> to vector<1xf32>
      %75 = vector.shape_cast %74 : vector<1xf32> to vector<1x1x1xf32>
      %76 = vector.extract %75[0, 0, 0] : f32 from vector<1x1x1xf32>
      %77 = vector.broadcast %76 : f32 to vector<1x1xf32>
      %cst_32 = arith.constant 2.000000e+00 : f32
      %78 = vector.broadcast %cst_32 : f32 to vector<1x1xf32>
      %79 = arith.divf %77, %78 : vector<1x1xf32>
      %80 = vector.broadcast %14 : f32 to vector<1x1xf32>
      %81 = arith.mulf %80, %79 : vector<1x1xf32>
      %c1_33 = arith.constant 1 : index
      %c0_34 = arith.constant 0 : index
      %c0_35 = arith.constant 0 : index
      %82 = vector.load %arg5[%c1_33, %c0_34, %c0_35] : memref<3x2x16xf32, #tpu.memory_space<vmem>>, vector<1x2x16xf32>
      %83 = vector.shape_cast %82 : vector<1x2x16xf32> to vector<2x16xf32>
      %c1_36 = arith.constant 1 : index
      %c0_37 = arith.constant 0 : index
      %c0_38 = arith.constant 0 : index
      %84 = vector.load %arg6[%c1_36, %c0_37, %c0_38] : memref<3x2x16xf32, #tpu.memory_space<vmem>>, vector<1x2x16xf32>
      %85 = vector.shape_cast %84 : vector<1x2x16xf32> to vector<2x16xf32>
      %86 = arith.subf %83, %85 : vector<2x16xf32>
      %87 = arith.mulf %86, %86 : vector<2x16xf32>
      %cst_39 = arith.constant dense<0.000000e+00> : vector<2xf32>
      %88 = vector.multi_reduction <add>, %87, %cst_39 [1] : vector<2x16xf32> to vector<2xf32>
      %89 = vector.shape_cast %88 : vector<2xf32> to vector<2x1xf32>
      %90 = arith.mulf %89, %60 : vector<2x1xf32>
      %91 = vector.shape_cast %90 : vector<2x1xf32> to vector<1x2x1xf32>
      %cst_40 = arith.constant dense<0.000000e+00> : vector<1xf32>
      %92 = vector.multi_reduction <add>, %91, %cst_40 [1, 2] : vector<1x2x1xf32> to vector<1xf32>
      %93 = vector.shape_cast %92 : vector<1xf32> to vector<1x1x1xf32>
      %94 = vector.extract %93[0, 0, 0] : f32 from vector<1x1x1xf32>
      %95 = vector.broadcast %94 : f32 to vector<1x1xf32>
      %cst_41 = arith.constant 2.000000e+00 : f32
      %96 = vector.broadcast %cst_41 : f32 to vector<1x1xf32>
      %97 = arith.divf %95, %96 : vector<1x1xf32>
      %98 = vector.broadcast %15 : f32 to vector<1x1xf32>
      %99 = arith.mulf %98, %97 : vector<1x1xf32>
      %c2_42 = arith.constant 2 : index
      %c0_43 = arith.constant 0 : index
      %c0_44 = arith.constant 0 : index
      %100 = vector.load %arg5[%c2_42, %c0_43, %c0_44] : memref<3x2x16xf32, #tpu.memory_space<vmem>>, vector<1x2x16xf32>
      %101 = vector.shape_cast %100 : vector<1x2x16xf32> to vector<2x16xf32>
      %c2_45 = arith.constant 2 : index
      %c0_46 = arith.constant 0 : index
      %c0_47 = arith.constant 0 : index
      %102 = vector.load %arg6[%c2_45, %c0_46, %c0_47] : memref<3x2x16xf32, #tpu.memory_space<vmem>>, vector<1x2x16xf32>
      %103 = vector.shape_cast %102 : vector<1x2x16xf32> to vector<2x16xf32>
      %104 = arith.subf %101, %103 : vector<2x16xf32>
      %105 = arith.mulf %104, %104 : vector<2x16xf32>
      %cst_48 = arith.constant dense<0.000000e+00> : vector<2xf32>
      %106 = vector.multi_reduction <add>, %105, %cst_48 [1] : vector<2x16xf32> to vector<2xf32>
      %107 = vector.shape_cast %106 : vector<2xf32> to vector<2x1xf32>
      %108 = arith.mulf %107, %60 : vector<2x1xf32>
      %109 = vector.shape_cast %108 : vector<2x1xf32> to vector<1x2x1xf32>
      %cst_49 = arith.constant dense<0.000000e+00> : vector<1xf32>
      %110 = vector.multi_reduction <add>, %109, %cst_49 [1, 2] : vector<1x2x1xf32> to vector<1xf32>
      %111 = vector.shape_cast %110 : vector<1xf32> to vector<1x1x1xf32>
      %112 = vector.extract %111[0, 0, 0] : f32 from vector<1x1x1xf32>
      %113 = vector.broadcast %112 : f32 to vector<1x1xf32>
      %cst_50 = arith.constant 2.000000e+00 : f32
      %114 = vector.broadcast %cst_50 : f32 to vector<1x1xf32>
      %115 = arith.divf %113, %114 : vector<1x1xf32>
      %116 = vector.broadcast %16 : f32 to vector<1x1xf32>
      %117 = arith.mulf %116, %115 : vector<1x1xf32>
      %c0_51 = arith.constant 0 : index
      %c0_52 = arith.constant 0 : index
      %118 = vector.load %arg18[%c0_51, %c0_52] : memref<2x128xf32, #tpu.memory_space<vmem>>, vector<2x128xf32>
      %cst_53 = arith.constant dense<0.000000e+00> : vector<2xf32>
      %119 = vector.multi_reduction <add>, %118, %cst_53 [1] : vector<2x128xf32> to vector<2xf32>
      %120 = vector.shape_cast %119 : vector<2xf32> to vector<2x1xf32>
      %c0_54 = arith.constant 0 : index
      %c0_55 = arith.constant 0 : index
      %121 = vector.load %arg19[%c0_54, %c0_55] : memref<2x128xf32, #tpu.memory_space<vmem>>, vector<2x128xf32>
      %cst_56 = arith.constant dense<0.000000e+00> : vector<2xf32>
      %122 = vector.multi_reduction <add>, %121, %cst_56 [1] : vector<2x128xf32> to vector<2xf32>
      %123 = vector.shape_cast %122 : vector<2xf32> to vector<2x1xf32>
      %124 = arith.mulf %120, %63 : vector<2x1xf32>
      %125 = vector.shape_cast %124 : vector<2x1xf32> to vector<1x2x1xf32>
      %cst_57 = arith.constant dense<0.000000e+00> : vector<1xf32>
      %126 = vector.multi_reduction <add>, %125, %cst_57 [1, 2] : vector<1x2x1xf32> to vector<1xf32>
      %127 = vector.shape_cast %126 : vector<1xf32> to vector<1x1x1xf32>
      %128 = vector.extract %127[0, 0, 0] : f32 from vector<1x1x1xf32>
      %129 = vector.broadcast %128 : f32 to vector<1x1xf32>
      %cst_58 = arith.constant 2.000000e+00 : f32
      %130 = vector.broadcast %cst_58 : f32 to vector<1x1xf32>
      %131 = arith.divf %129, %130 : vector<1x1xf32>
      %132 = vector.broadcast %17 : f32 to vector<1x1xf32>
      %133 = arith.mulf %132, %131 : vector<1x1xf32>
      %134 = arith.mulf %123, %63 : vector<2x1xf32>
      %135 = vector.shape_cast %134 : vector<2x1xf32> to vector<1x2x1xf32>
      %cst_59 = arith.constant dense<0.000000e+00> : vector<1xf32>
      %136 = vector.multi_reduction <add>, %135, %cst_59 [1, 2] : vector<1x2x1xf32> to vector<1xf32>
      %137 = vector.shape_cast %136 : vector<1xf32> to vector<1x1x1xf32>
      %138 = vector.extract %137[0, 0, 0] : f32 from vector<1x1x1xf32>
      %139 = vector.broadcast %138 : f32 to vector<1x1xf32>
      %cst_60 = arith.constant 2.000000e+00 : f32
      %140 = vector.broadcast %cst_60 : f32 to vector<1x1xf32>
      %141 = arith.divf %139, %140 : vector<1x1xf32>
      %142 = vector.broadcast %17 : f32 to vector<1x1xf32>
      %143 = arith.mulf %142, %141 : vector<1x1xf32>
      %144 = arith.addf %45, %55 : vector<1x1xf32>
      %145 = arith.addf %144, %81 : vector<1x1xf32>
      %146 = arith.addf %145, %99 : vector<1x1xf32>
      %147 = arith.addf %146, %117 : vector<1x1xf32>
      %148 = arith.addf %147, %133 : vector<1x1xf32>
      %149 = arith.addf %148, %143 : vector<1x1xf32>
      %c0_61 = arith.constant 0 : index
      %c0_62 = arith.constant 0 : index
      %150 = vector.load %arg10[%c0_61, %c0_62] : memref<1x1xf32, #tpu.memory_space<vmem>>, vector<1x1xf32>
      tpu.vector_store %arg10[%c0_61, %c0_62], %149 {strides = array<i32>} : memref<1x1xf32, #tpu.memory_space<vmem>>, vector<1x1xf32>,
      %c0_63 = arith.constant 0 : index
      %c0_64 = arith.constant 0 : index
      %151 = vector.load %arg11[%c0_63, %c0_64] : memref<1x1xf32, #tpu.memory_space<vmem>>, vector<1x1xf32>
      tpu.vector_store %arg11[%c0_63, %c0_64], %45 {strides = array<i32>} : memref<1x1xf32, #tpu.memory_space<vmem>>, vector<1x1xf32>,
      %c0_65 = arith.constant 0 : index
      %c0_66 = arith.constant 0 : index
      %152 = vector.load %arg12[%c0_65, %c0_66] : memref<1x1xf32, #tpu.memory_space<vmem>>, vector<1x1xf32>
      tpu.vector_store %arg12[%c0_65, %c0_66], %55 {strides = array<i32>} : memref<1x1xf32, #tpu.memory_space<vmem>>, vector<1x1xf32>,
      %c0_67 = arith.constant 0 : index
      %c0_68 = arith.constant 0 : index
      %153 = vector.load %arg13[%c0_67, %c0_68] : memref<1x1xf32, #tpu.memory_space<vmem>>, vector<1x1xf32>
      tpu.vector_store %arg13[%c0_67, %c0_68], %81 {strides = array<i32>} : memref<1x1xf32, #tpu.memory_space<vmem>>, vector<1x1xf32>,
      %c0_69 = arith.constant 0 : index
      %c0_70 = arith.constant 0 : index
      %154 = vector.load %arg14[%c0_69, %c0_70] : memref<1x1xf32, #tpu.memory_space<vmem>>, vector<1x1xf32>
      tpu.vector_store %arg14[%c0_69, %c0_70], %99 {strides = array<i32>} : memref<1x1xf32, #tpu.memory_space<vmem>>, vector<1x1xf32>,
      %c0_71 = arith.constant 0 : index
      %c0_72 = arith.constant 0 : index
      %155 = vector.load %arg15[%c0_71, %c0_72] : memref<1x1xf32, #tpu.memory_space<vmem>>, vector<1x1xf32>
      tpu.vector_store %arg15[%c0_71, %c0_72], %117 {strides = array<i32>} : memref<1x1xf32, #tpu.memory_space<vmem>>, vector<1x1xf32>,
      %c0_73 = arith.constant 0 : index
      %c0_74 = arith.constant 0 : index
      %156 = vector.load %arg16[%c0_73, %c0_74] : memref<1x1xf32, #tpu.memory_space<vmem>>, vector<1x1xf32>
      tpu.vector_store %arg16[%c0_73, %c0_74], %133 {strides = array<i32>} : memref<1x1xf32, #tpu.memory_space<vmem>>, vector<1x1xf32>,
      %c0_75 = arith.constant 0 : index
      %c0_76 = arith.constant 0 : index
      %157 = vector.load %arg17[%c0_75, %c0_76] : memref<1x1xf32, #tpu.memory_space<vmem>>, vector<1x1xf32>
      tpu.vector_store %arg17[%c0_75, %c0_76], %143 {strides = array<i32>} : memref<1x1xf32, #tpu.memory_space<vmem>>, vector<1x1xf32>,
    } else {
    }
    return
  }
  func.func @transform_0(%arg0: i32) -> i32 {
    %c0_i32 = arith.constant 0 : i32
    %c0_i32_0 = arith.constant 0 : i32
    return %c0_i32 : i32
  }
  func.func @transform_1(%arg0: i32) -> (i32, i32) {
    %c0_i32 = arith.constant 0 : i32
    %c0_i32_0 = arith.constant 0 : i32
    %c0_i32_1 = arith.constant 0 : i32
    return %c0_i32, %c0_i32_0 : i32, i32
  }
  func.func @transform_2(%arg0: i32) -> (i32, i32) {
    %c0_i32 = arith.constant 0 : i32
    %c0_i32_0 = arith.constant 0 : i32
    %c0_i32_1 = arith.constant 0 : i32
    return %c0_i32, %c0_i32_0 : i32, i32
  }
  func.func @transform_3(%arg0: i32) -> (i32, i32) {
    %c0_i32 = arith.constant 0 : i32
    %c0_i32_0 = arith.constant 0 : i32
    %c0_i32_1 = arith.constant 0 : i32
    return %c0_i32, %c0_i32_0 : i32, i32
  }
  func.func @transform_4(%arg0: i32) -> (i32, i32, i32) {
    %c0_i32 = arith.constant 0 : i32
    %c0_i32_0 = arith.constant 0 : i32
    %c0_i32_1 = arith.constant 0 : i32
    %c0_i32_2 = arith.constant 0 : i32
    return %c0_i32, %c0_i32_0, %c0_i32_1 : i32, i32, i32
  }
  func.func @transform_5(%arg0: i32) -> (i32, i32, i32) {
    %c0_i32 = arith.constant 0 : i32
    %c0_i32_0 = arith.constant 0 : i32
    %c0_i32_1 = arith.constant 0 : i32
    %c0_i32_2 = arith.constant 0 : i32
    return %c0_i32, %c0_i32_0, %c0_i32_1 : i32, i32, i32
  }
  func.func @transform_6(%arg0: i32) -> (i32, i32, i32) {
    %c0_i32 = arith.constant 0 : i32
    %c0_i32_0 = arith.constant 0 : i32
    %c0_i32_1 = arith.constant 0 : i32
    %c0_i32_2 = arith.constant 0 : i32
    return %c0_i32, %c0_i32_0, %c0_i32_1 : i32, i32, i32
  }
  func.func @transform_7(%arg0: i32) -> (i32, i32, i32) {
    %c0_i32 = arith.constant 0 : i32
    %c0_i32_0 = arith.constant 0 : i32
    %c0_i32_1 = arith.constant 0 : i32
    return %c0_i32, %arg0, %c0_i32_0 : i32, i32, i32
  }
  func.func @transform_8(%arg0: i32) -> (i32, i32, i32) {
    %c0_i32 = arith.constant 0 : i32
    %c0_i32_0 = arith.constant 0 : i32
    %c0_i32_1 = arith.constant 0 : i32
    return %c0_i32, %arg0, %c0_i32_0 : i32, i32, i32
  }
  func.func @transform_9(%arg0: i32) -> (i32, i32) {
    %c0_i32 = arith.constant 0 : i32
    %c0_i32_0 = arith.constant 0 : i32
    %c0_i32_1 = arith.constant 0 : i32
    return %c0_i32, %c0_i32_0 : i32, i32
  }
  func.func @transform_10(%arg0: i32) -> (i32, i32) {
    %c0_i32 = arith.constant 0 : i32
    %c0_i32_0 = arith.constant 0 : i32
    %c0_i32_1 = arith.constant 0 : i32
    return %c0_i32, %c0_i32_0 : i32, i32
  }
  func.func @transform_11(%arg0: i32) -> (i32, i32) {
    %c0_i32 = arith.constant 0 : i32
    %c0_i32_0 = arith.constant 0 : i32
    %c0_i32_1 = arith.constant 0 : i32
    return %c0_i32, %c0_i32_0 : i32, i32
  }
  func.func @transform_12(%arg0: i32) -> (i32, i32) {
    %c0_i32 = arith.constant 0 : i32
    %c0_i32_0 = arith.constant 0 : i32
    %c0_i32_1 = arith.constant 0 : i32
    return %c0_i32, %c0_i32_0 : i32, i32
  }
  func.func @transform_13(%arg0: i32) -> (i32, i32) {
    %c0_i32 = arith.constant 0 : i32
    %c0_i32_0 = arith.constant 0 : i32
    %c0_i32_1 = arith.constant 0 : i32
    return %c0_i32, %c0_i32_0 : i32, i32
  }
  func.func @transform_14(%arg0: i32) -> (i32, i32) {
    %c0_i32 = arith.constant 0 : i32
    %c0_i32_0 = arith.constant 0 : i32
    %c0_i32_1 = arith.constant 0 : i32
    return %c0_i32, %c0_i32_0 : i32, i32
  }
  func.func @transform_15(%arg0: i32) -> (i32, i32) {
    %c0_i32 = arith.constant 0 : i32
    %c0_i32_0 = arith.constant 0 : i32
    %c0_i32_1 = arith.constant 0 : i32
    return %c0_i32, %c0_i32_0 : i32, i32
  }
  func.func @transform_16(%arg0: i32) -> (i32, i32) {
    %c0_i32 = arith.constant 0 : i32
    %c0_i32_0 = arith.constant 0 : i32
    %c0_i32_1 = arith.constant 0 : i32
    return %c0_i32, %c0_i32_0 : i32, i32
  }
}

</mosaic_0001>

<bundles_post_ra>
// kernel: tpu_custom_call.1
= control target key start
LH: loop header
LB: loop body
LE: loop exit
PB: predicated region body
PF: predicated region fallthrough
CT: control target
= control target key end

     0   :  { %s2005_s0 = inlined_call_operand.vmem [shape: f32[8], index: 0, kind: input, shape index: {}]   ;;  %s2006_s1 = inlined_call_operand.vmem [shape: f32[2,8], index: 1, kind: input, shape index: {}]   ;;  %s2007_s2 = inlined_call_operand.vmem [shape: f32[2,8], index: 2, kind: input, shape index: {}]   ;;  %s2008_s3 = inlined_call_operand.vmem [shape: f32[1,128], index: 3, kind: input, shape index: {}]   ;;  %s2009_s4 = inlined_call_operand.vmem [shape: f32[3,2,16], index: 4, kind: input, shape index: {}]   ;;  %s2010_s5 = inlined_call_operand.vmem [shape: f32[3,2,16], index: 5, kind: input, shape index: {}]   ;;  %s2011_s6 = inlined_call_operand.vmem [shape: f32[2,2,1], index: 6, kind: input, shape index: {}]   ;;  %s2012_s7 = inlined_call_operand.vmem [shape: f32[2,13,128], index: 7, kind: input, shape index: {}]   ;;  %s2013_s8 = inlined_call_operand.vmem [shape: f32[2,13,128], index: 8, kind: input, shape index: {}]   ;;  %s2014_s9 = inlined_call_operand.hbm [shape: f32[1,1], index: 9, kind: output, shape index: {0}]   ;;  %s2015_s10 = inlined_call_operand.hbm [shape: f32[1,1], index: 10, kind: output, shape index: {1}]   ;;  %s2016_s11 = inlined_call_operand.hbm [shape: f32[1,1], index: 11, kind: output, shape index: {2}]   ;;  %s2017_s12 = inlined_call_operand.hbm [shape: f32[1,1], index: 12, kind: output, shape index: {3}]   ;;  %s2018_s13 = inlined_call_operand.hbm [shape: f32[1,1], index: 13, kind: output, shape index: {4}]   ;;  %s2019_s14 = inlined_call_operand.hbm [shape: f32[1,1], index: 14, kind: output, shape index: {5}]   ;;  %s2020_s15 = inlined_call_operand.hbm [shape: f32[1,1], index: 15, kind: output, shape index: {6}]   ;;  %s2021_s16 = inlined_call_operand.hbm [shape: f32[1,1], index: 16, kind: output, shape index: {7}]  }
   0x1   :  { %2027 = sst [smem:[#allocation29_spill]] %s2005_s0 }
   0x2   :  { %2028 = sst [smem:[#allocation30_spill]] %s2018_s13 }
   0x3   :  { %2029 = sst [smem:[#allocation31_spill]] %s2020_s15 }
   0x4   :  { %2030 = sst [smem:[#allocation32_spill]] %s2021_s16 }
   0x5   :  { %22 = vsyncpa [#allocation6], 0 }
   0x6   :  { %23 = vsyncpa [#allocation5], 0 }
   0x7   :  { %24 = vsyncpa [#allocation11], 0 }
   0x8   :  { %25 = vsyncpa [#allocation14], 0 }
   0x9   :  { %26 = vsyncpa [#allocation17], 0 }
   0xa   :  { %27 = vsyncpa [#allocation20], 0  ;;  %s1676_s21 = smov 0   ;;  %s1678_s22 = smov 0  }
   0xb   :  { %s1680_s23 = smov 0  }
   0xc LB: > { %s1692_s24 = sadd.s32 4294967295, %s1579_s23   ;;  %s1695_s25 = sadd.s32 1, %s1579_s23   ;;  %s1579_s23 = sphi %s1680_s23, %s2041_s23   ;;  %s1575_s22 = sphi %s1678_s22, %s2044_s22   ;;  %s1571_s21 = sphi %s1676_s21, %s2043_s21  }
   0xd   : > { %2031 = sst [smem:[#allocation27_spill]] %s1695_s25  ;;  %s184_s26 = ssub.s32 %s1579_s23, %s1695_s25 }
   0xe   : > { %s187_s27 = sadd.s32 1, %s1575_s22  ;;  %p185_p0 = scmp.eq.s32.totalorder %s184_s26, 0 }
   0xf   : > { %p194_p1 = scmp.ne.s32.totalorder %s1575_s22, %s1571_s21  ;;  %p195_p2 = scmp.eq.s32.totalorder %s1579_s23, 0 }
  0x10   : > { %p1151_p3 = scmp.ge.s32.totalorder %s1579_s23, 1  ;;  %p405_p5 = scmp.lt.s32.totalorder %s1579_s23, 3 }
  0x11   : > { %s1705_s28 = scalar_select %p185_p0, %s1575_s22, %s187_s27  }
  0x12   : > { %p1707_p4 = por %p195_p2, %p194_p1  ;;  %p1248_p7 = scmp.eq.s32.totalorder %s1692_s24, 0 }
  0x13   : > { %2032 = sst [smem:[#allocation28_spill]] %s1705_s28  ;;  %p1714_p8 = pnand %p1151_p3, %p405_p5 }
  0x14   : > { %s2035_s18 = sld [smem:[#allocation29_spill]] }
  0x15   : > { %p1244_p9 = pneg %p1714_p8 }
  0x17   : > { %p1245_p10 = pnand %p1248_p7, %p1244_p9 }
  0x19   : > { %p1312_p12 = pneg %p1245_p10 }
  0x1a   : > { %s418_s19 = sshll.u32 %s2035_s18, 4  ;;  %s419_s19 = int_to_ptr.vmem [resolvable:$true] %s418_s19 }
  0x1b   : > { %s1310_s20 = scalar_lea.vmem %s419_s19, 16  ;;  %p1318_p1 = scmp.lt.s32.totalorder %s419_s19, %s419_s19 }
  0x1c   : > { %p1311_p11 = scmp.ne.s32.totalorder %s419_s19, %s1310_s20  ;;  %p1319_p2 = scmp.lt.s32.totalorder %s1310_s20, %s1310_s20 }
  0x1e   : > { %p1313_p13 = pnand %p1312_p12, %p1311_p11  ;;  %p1320_p3 = por %p1319_p2, %p1318_p1 }
  0x20   : > { %p1314_p0 = pneg %p1313_p13 }
  0x22   : > { %p1321_p5 = pnand %p1320_p3, %p1314_p0 }
  0x24   : > { %1324 = shalt.err (!%p1321_p5)
}
  0x25   : > { %s1581_s26 = smov [#allocation4]   ;;  %p1153_p6 = scmp.ge.s32.totalorder %s1579_s23, 2 }
  0x26   : > { %1247 = dma.vmem_to_smem (!%p1245_p10), %s419_s19, 16, %s1581_s26, [#allocation6]  }
  0x27   : > { %443 = sbr.rel (%p1153_p6) target bundleno = 60 (0x3c), region = 44 }
  0x2e   : > { %446 = sbr.rel (!%p1707_p4) target bundleno = 53 (0x35), region = 48  ;;  %s448_s27 = sand.u32 (%p1707_p4), 1, %s1575_s22  }
  0x2f   : > { %s1155_s0 = sshll.u32 (%p1707_p4), %s1579_s23, 3  ;;  %s1154_s17 = sshll.u32 (%p1707_p4), %s448_s27, 4 }
  0x30   : > { %s452_s20 = scalar_lea.vmem (%p1707_p4), %s2012_s7, %s1155_s0  ;;  %s450_s25 = scalar_lea.vmem (%p1707_p4), [#allocation7], %s1154_s17 }
  0x31   : > { %v482_v0 = vld [vmem:[%s452_s20] sm:$0xff] (%p1707_p4)  ;;  %v484_v1 = vld [vmem:[%s452_s20 + $0x10] sm:$0xff] (%p1707_p4) }
  0x32   : > { %483 = vst [vmem:[%s450_s25] sm:$0xff] (%p1707_p4), %v482_v0  ;;  %485 = vst [vmem:[%s450_s25 + $0x8] sm:$0xff] (%p1707_p4), %v484_v1 }
  0x35 PF: > { %491 = sbr.rel (!%p1707_p4) target bundleno = 60 (0x3c), region = 86  ;;  %s493_s19 = sand.u32 (%p1707_p4), 1, %s1575_s22  }
  0x36   : > { %s1157_s26 = sshll.u32 (%p1707_p4), %s1579_s23, 3  ;;  %s1156_s16 = sshll.u32 (%p1707_p4), %s493_s19, 4 }
  0x37   : > { %s497_s13 = scalar_lea.vmem (%p1707_p4), %s2013_s8, %s1157_s26  ;;  %s495_s28 = scalar_lea.vmem (%p1707_p4), [#allocation8], %s1156_s16 }
  0x38   : > { %v527_v2 = vld [vmem:[%s497_s13] sm:$0xff] (%p1707_p4)  ;;  %v529_v3 = vld [vmem:[%s497_s13 + $0x10] sm:$0xff] (%p1707_p4) }
  0x39   : > { %528 = vst [vmem:[%s495_s28] sm:$0xff] (%p1707_p4), %v527_v2  ;;  %530 = vst [vmem:[%s495_s28 + $0x8] sm:$0xff] (%p1707_p4), %v529_v3 }
  0x3c PF: > { %539 = sbr.rel (%p1714_p8) target bundleno = 1012 (0x3f4), region = 124 }
  0x43   : > { %1546 = dma.done.wait (%p1248_p7), [#allocation6], 16  }
  0x44   : > { %1548 = vsyncadd (%p1248_p7), [#allocation6], 4294967280  ;;  %s546_s23 = sand.u32 1, %s1571_s21  }
  0x45   : > { %s1160_s15 = sshll.u32 %s546_s23, 4 }
  0x46   : > { %s1747_s25 = scalar_lea.vmem [#allocation7], %s1160_s15  ;;  %s1749_s13 = scalar_lea.vmem [#allocation8], %s1160_s15 }
  0x47   : > { %559 = sfence }
  0x48   : > { %p2036_p4 = scmp.ne.s32.totalorder %s1692_s24, 0 }
  0x49   : > { %v1582_v4 = vmov (!%p2036_p4), 0.0  }
  0x4a   : > { %605 = sbr.rel (%p2036_p4) target bundleno = 81 (0x51), region = 140  ;;  %606 = vst [vmem:[#allocation2] sm:$0x3] (!%p2036_p4), %v1582_v4  ;;  %607 = vst [vmem:[#allocation3] sm:$0x3] (!%p2036_p4), %v1582_v4 }
  0x51 PF: > { %p1163_p6 = scmp.ge.s32.totalorder %s1692_s24, 1 }
  0x52   : > { %v612_v5 = vld [vmem:[%s1747_s25] sm:$0xff] (!%p1163_p6)  ;;  %v613_v6 = vld [vmem:[%s1747_s25 + $0x8] sm:$0xff] (!%p1163_p6)  ;;  %vm635_vm0 = vcmask (!%p1163_p6), 1041409  }
  0x53   : > { %611 = sbr.rel (%p1163_p6) target bundleno = 104 (0x68), region = 144  ;;  %v614_v7 = vld [vmem:[%s1749_s13] sm:$0xff] (!%p1163_p6)  ;;  %v615_v8 = vld [vmem:[%s1749_s13 + $0x8] sm:$0xff] (!%p1163_p6) }
  0x54   : > { %v616_v9 = vsub.f32 (!%p1163_p6), %v612_v5, %v614_v7  ;;  %v617_v10 = vsub.f32 (!%p1163_p6), %v613_v6, %v615_v8  ;;  %v618_v37 = vld [vmem:[#allocation2] sm:$0x3] (!%p1163_p6)  ;;  %v640_v39 = vld [vmem:[#allocation3] sm:$0x3] (!%p1163_p6) }
  0x56   : > { %v619_v11 = vand.u32 (!%p1163_p6), 2147483647, %v616_v9  ;;  %v641_v12 = vmul.f32 (!%p1163_p6), %v616_v9, %v616_v9  ;;  %v620_v13 = vand.u32 (!%p1163_p6), 2147483647, %v617_v10  ;;  %v642_v14 = vmul.f32 (!%p1163_p6), %v617_v10, %v617_v10 }
  0x58   : > { %v621_v15 = vrot.slane (!%p1163_p6), %v619_v11, 4  ;;  %v643_v16 = vrot.slane (!%p1163_p6), %v641_v12, 4  ;;  %v627_v17 = vrot.slane (!%p1163_p6), %v620_v13, 4  ;;  %v649_v18 = vrot.slane (!%p1163_p6), %v642_v14, 4 }
  0x5a   : > { %v622_v19 = vadd.f32 %v621_v15, %v619_v11  ;;  %v644_v20 = vadd.f32 %v643_v16, %v641_v12  ;;  %v628_v21 = vadd.f32 %v627_v17, %v620_v13  ;;  %v650_v22 = vadd.f32 %v649_v18, %v642_v14 }
  0x5c   : > { %v623_v23 = vrot.slane %v622_v19, 2  ;;  %v645_v24 = vrot.slane %v644_v20, 2  ;;  %v629_v25 = vrot.slane %v628_v21, 2  ;;  %v651_v26 = vrot.slane %v650_v22, 2 }
  0x5e   : > { %v624_v27 = vadd.f32 %v623_v23, %v622_v19  ;;  %v646_v28 = vadd.f32 %v645_v24, %v644_v20  ;;  %v630_v29 = vadd.f32 %v629_v25, %v628_v21  ;;  %v652_v30 = vadd.f32 %v651_v26, %v650_v22 }
  0x60   : > { %v625_v31 = vrot.slane %v624_v27, 1  ;;  %v647_v32 = vrot.slane %v646_v28, 1  ;;  %v631_v33 = vrot.slane %v630_v29, 1  ;;  %v653_v34 = vrot.slane %v652_v30, 1 }
  0x62   : > { %v626_v35 = vadd.f32 %v625_v31, %v624_v27  ;;  %v648_v36 = vadd.f32 %v647_v32, %v646_v28  ;;  %v632_v38 = vadd.f32 %v631_v33, %v630_v29  ;;  %v654_v40 = vadd.f32 %v653_v34, %v652_v30 }
  0x64   : > { %v636_v41 = vsel %vm635_vm0, %v632_v38, %v626_v35  ;;  %v657_v42 = vsel %vm635_vm0, %v654_v40, %v648_v36 }
  0x65   : > { %v638_v43 = vadd.f32 %v636_v41, %v618_v37  ;;  %v659_v44 = vadd.f32 %v657_v42, %v640_v39 }
  0x67   : > { %639 = vst [vmem:[#allocation2] sm:$0x3] %v638_v43  ;;  %660 = vst [vmem:[#allocation3] sm:$0x3] %v659_v44 }
  0x68 PF: > { %p1164_p7 = scmp.ne.s32.totalorder %s1692_s24, 1 }
  0x69   : > { %v1762_v45 = vld [vmem:[%s2006_s1] sm:$0x3] (!%p1164_p7)  ;;  %vm727_vm1 = vcmask (!%p1164_p7), 58368   ;;  %v671_v52 = vlaneseq (!%p1164_p7)  ;;  %v665_v53 = vld [vmem:[%s1747_s25] sm:$0xff] (!%p1164_p7)  ;;  %vm693_vm3 = vcmask (!%p1164_p7), 1041409   ;;  %vm797_vm4 = vcmask (!%p1164_p7), 123904  }
  0x6a   : > { %664 = sbr.rel (%p1164_p7) target bundleno = 808 (0x328), region = 148  ;;  %v728_v46 = vsel (!%p1164_p7), %vm727_vm1, %v1762_v45, -inf  ;;  %v666_v54 = vld [vmem:[%s1747_s25 + $0x8] sm:$0xff] (!%p1164_p7)  ;;  %v667_v55 = vld [vmem:[%s1749_s13] sm:$0xff] (!%p1164_p7)  ;;  %vm865_vm5 = vcmask (!%p1164_p7), 1041408   ;;  %s1170_s29 = sld [smem:[#allocation4 + $0x6]] (!%p1164_p7) }
  0x6b   : > { %729 = vmax.xlane.f32.xlu0 (!%p1164_p7), %v728_v46  ;;  %v672_v56 = vshrl.u32 (!%p1164_p7), %v671_v52, 7  ;;  %v668_v57 = vld [vmem:[%s1749_s13 + $0x8] sm:$0xff] (!%p1164_p7)  ;;  %v669_v58 = vsub.f32 (!%p1164_p7), %v665_v53, %v667_v55  ;;  %vm765_vm6 = vcmask (!%p1164_p7), 1040384   ;;  %vm747_vm7 = vcmask (!%p1164_p7), 1024   ;;  %s719_s20 = sld [smem:[#allocation4]] (!%p1164_p7)  ;;  %s1166_s19 = sld [smem:[#allocation4 + $0x2]] (!%p1164_p7) }
  0x6c   : > { %v670_v59 = vsub.f32 (!%p1164_p7), %v666_v54, %v668_v57  ;;  %v1172_v27 = vld [vmem:[%s2009_s4 + $0x2] sm:$0x3] (!%p1164_p7)  ;;  %v793_v41 = vld [vmem:[%s2009_s4] sm:$0x3] (!%p1164_p7)  ;;  %s1167_s26 = sld [smem:[#allocation4 + $0x3]] (!%p1164_p7)  ;;  %s1168_s23 = sld [smem:[#allocation4 + $0x4]] (!%p1164_p7) }
  0x6d   : > { %vm673_vm2 = vcmp.lt.s32.totalorder (!%p1164_p7), %v672_v56, 5  ;;  %v1173_v28 = vld [vmem:[%s2010_s5 + $0x2] sm:$0x3] (!%p1164_p7)  ;;  %v794_v42 = vld [vmem:[%s2010_s5] sm:$0x3] (!%p1164_p7)  ;;  %s1819_s15 = sld [smem:[#allocation4 + $0x5]] (!%p1164_p7) }
  0x6e   : > { %v674_v60 = vsel (!%p1164_p7), %vm673_vm2, %v669_v58, 0.0  ;;  %v675_v61 = vsel (!%p1164_p7), %vm673_vm2, %v670_v59, 0.0  ;;  %v676_v24 = vld [vmem:[#allocation2] sm:$0x3] (!%p1164_p7)  ;;  %v820_v30 = vsub.f32 (!%p1164_p7), %v1172_v27, %v1173_v28  ;;  %v698_v32 = vld [vmem:[#allocation3] sm:$0x3] (!%p1164_p7)  ;;  %v795_v46 = vsub.f32 (!%p1164_p7), %v793_v41, %v794_v42 }
  0x6f   : > { %v677_v62 = vand.u32 (!%p1164_p7), 2147483647, %v674_v60  ;;  %v678_v63 = vand.u32 (!%p1164_p7), 2147483647, %v675_v61  ;;  %v699_v1 = vmul.f32 (!%p1164_p7), %v674_v60, %v674_v60  ;;  %v700_v2 = vmul.f32 (!%p1164_p7), %v675_v61, %v675_v61  ;;  %v763_v59 = vld [vmem:[%s2008_s3] sm:$0x1] (!%p1164_p7) }
  0x70   : > { %v821_v35 = vmul.f32 (!%p1164_p7), %v820_v30, %v820_v30  ;;  %v796_v53 = vmul.f32 (!%p1164_p7), %v795_v46, %v795_v46  ;;  %v764_v60 = vmul.f32 (!%p1164_p7), %v763_v59, %v763_v59  ;;  %v786_v61 = vld [vmem:[%s2011_s6] sm:$0x3] (!%p1164_p7)  ;;  %vm908_vm8 = vcmask (!%p1164_p7), 0   ;;  %s1165_s16 = sld [smem:[#allocation4 + $0x1]] (!%p1164_p7) }
  0x71   : > { %v679_v0 = vrot.slane %v677_v62, 4  ;;  %v685_v3 = vrot.slane %v678_v63, 4  ;;  %v701_v5 = vrot.slane %v699_v1, 4  ;;  %v707_v6 = vrot.slane %v700_v2, 4 }
  0x72   : > { %v822_v36 = vsel %vm797_vm4, %v821_v35, 0.0  ;;  %v798_v55 = vsel %vm797_vm4, %v796_v53, 0.0 }
  0x73   : > { %v680_v4 = vadd.f32 %v679_v0, %v677_v62  ;;  %v686_v7 = vadd.f32 %v685_v3, %v678_v63  ;;  %v702_v9 = vadd.f32 %v701_v5, %v699_v1  ;;  %v708_v10 = vadd.f32 %v707_v6, %v700_v2  ;;  %v1171_v63 = vld [vmem:[%s2011_s6 + $0x2] sm:$0x3] }
  0x74   : > { %v766_v62 = vsel %vm765_vm6, %v764_v60, 0.0  ;;  %v790_v0 = vstv %s1170_s29 }
  0x75   : > { %v681_v8 = vrot.slane %v680_v4, 2  ;;  %v687_v11 = vrot.slane %v686_v7, 2  ;;  %v703_v13 = vrot.slane %v702_v9, 2  ;;  %v709_v14 = vrot.slane %v708_v10, 2 }
  0x76   : > { %v791_v1 = vmul.f32 %v1171_v63, %v790_v0 }
  0x77   : > { %v682_v12 = vadd.f32 %v681_v8, %v680_v4  ;;  %v688_v15 = vadd.f32 %v687_v11, %v686_v7  ;;  %v704_v17 = vadd.f32 %v703_v13, %v702_v9  ;;  %v710_v18 = vadd.f32 %v709_v14, %v708_v10 }
  0x79   : > { %v683_v16 = vrot.slane %v682_v12, 1  ;;  %v689_v19 = vrot.slane %v688_v15, 1  ;;  %v705_v21 = vrot.slane %v704_v17, 1  ;;  %v711_v22 = vrot.slane %v710_v18, 1 }
  0x7b   : > { %v684_v20 = vadd.f32 %v683_v16, %v682_v12  ;;  %v690_v23 = vadd.f32 %v689_v19, %v688_v15  ;;  %v706_v25 = vadd.f32 %v705_v21, %v704_v17  ;;  %v712_v26 = vadd.f32 %v711_v22, %v710_v18 }
  0x7d   : > { %v694_v29 = vsel %vm693_vm3, %v690_v23, %v684_v20  ;;  %v715_v33 = vsel %vm693_vm3, %v712_v26, %v706_v25 }
  0x7e   : > { %v696_v31 = vadd.f32 %v694_v29, %v676_v24  ;;  %v717_v34 = vadd.f32 %v715_v33, %v698_v32 }
  0x80   : > { %697 = vst [vmem:[#allocation2] sm:$0x3] %v696_v31  ;;  %718 = vst [vmem:[#allocation3] sm:$0x3] %v717_v34 }
  0x87   : > { %v864_v37 = vld [vmem:[#allocation2] sm:$0x3]  ;;  %v869_v58 = vld [vmem:[#allocation3] sm:$0x3] }
  0x88   : > { %v866_v38 = vsel %vm865_vm5, %v864_v37, 0.0 }
  0xf8   : > { %v1766_v47 = vpop.xlane.xlu0 %729 }
  0xf9   : > { %v731_v48 = vsub.f32 %v1762_v45, %v1766_v47 }
  0xfb   : > { %v732_v49 = vmul.f32 1.442695, %v731_v48  ;;  %v740_v48 = vld [vmem:[%s2007_s2] sm:$0x3] }
  0xfd   : > { %1300 = vpow2.f32 %v732_v49  ;;  %v1174_v49 = vld [vmem:[%s2009_s4 + $0x4] sm:$0x3] }
 0x107   : > { %v1301_v50 = vpop.eup %1300 }
 0x108   : > { %v734_v51 = vsel %vm727_vm1, %v1301_v50, 0.0  ;;  %v1175_v50 = vld [vmem:[%s2010_s5 + $0x4] sm:$0x3] }
 0x109   : > { %735 = vadd.xlane.f32.xlu0 %v734_v51  ;;  %v844_v54 = vsub.f32 %v1174_v49, %v1175_v50 }
 0x10b   : > { %v845_v56 = vmul.f32 %v844_v54, %v844_v54 }
 0x10d   : > { %823 = vadd.xlane.f32.xlu0 %v822_v36  ;;  %v846_v57 = vsel %vm797_vm4, %v845_v56, 0.0 }
 0x111   : > { %867 = vadd.xlane.f32.xlu0 %v866_v38 }
 0x196   : > { %v736_v39 = vpop.xlane.xlu0 %735 }
 0x197   : > { %1302 = vlog2.f32 %v736_v39 }
 0x198   : > { %1304 = vrcp.f32 %v786_v61 }
 0x199   : > { %1306 = vrcp.f32 %v791_v1 }
 0x19a   : > { %v824_v3 = vpop.xlane.xlu0 %823 }
 0x19e   : > { %v868_v7 = vpop.xlane.xlu0 %867 }
 0x1a1   : > { %v1303_v40 = vpop.eup %1302 }
 0x1a2   : > { %v738_v43 = vmul.f32 0.6931472, %v1303_v40  ;;  %v1305_v2 = vpop.eup %1304 }
 0x1a3   : > { %v825_v4 = vmul.f32 %v1305_v2, %v824_v3  ;;  %v1307_v6 = vpop.eup %1306 }
 0x1a4   : > { %v739_v44 = vadd.f32 %v738_v43, %v1766_v47  ;;  %v873_v8 = vmul.f32 %v1307_v6, %v868_v7 }
 0x1a5   : > { %v826_v5 = vsel %vm747_vm7, %v825_v4, 0.0 }
 0x1a6   : > { %v741_v51 = vsub.f32 %v1762_v45, %v739_v44  ;;  %v870_v45 = vsel %vm865_vm5, %v869_v58, 0.0  ;;  %v874_v9 = vsel %vm747_vm7, %v873_v8, 0.0  ;;  %v761_v8 = vstv %s719_s20 }
 0x1a8   : > { %v742_v52 = vmul.f32 %v741_v51, %v740_v48 }
 0x1aa   : > { %v743_v47 = vsel %vm727_vm1, %v742_v52, 0.0 }
 0x1ab   : > { %744 = vadd.xlane.f32.xlu1 %v743_v47 }
 0x1af   : > { %799 = vadd.xlane.f32.xlu1 %v798_v55 }
 0x1b3   : > { %847 = vadd.xlane.f32.xlu1 %v846_v57 }
 0x1b7   : > { %871 = vadd.xlane.f32.xlu1 %v870_v45 }
 0x1bb   : > { %767 = vadd.xlane.f32.xlu1 %v766_v62 }
 0x1bf   : > { %827 = vadd.xlane.f32.xlu1 %v826_v5 }
 0x1c3   : > { %875 = vadd.xlane.f32.xlu1 %v874_v9 }
 0x238   : > { %v745_v10 = vpop.xlane.xlu1 %744 }
 0x239   : > { %v746_v11 = vsub.f32 0.0, %v745_v10 }
 0x23b   : > { %v748_v12 = vsel %vm747_vm7, %v746_v11, 0.0 }
 0x23c   : > { %749 = vadd.xlane.f32.xlu0 %v748_v12  ;;  %v800_v13 = vpop.xlane.xlu1 %799 }
 0x23d   : > { %v801_v14 = vmul.f32 %v1305_v2, %v800_v13  ;;  %v814_v13 = vstv %s1166_s19 }
 0x23f   : > { %v802_v15 = vsel %vm747_vm7, %v801_v14, 0.0 }
 0x240   : > { %v848_v16 = vpop.xlane.xlu1 %847  ;;  %803 = vadd.xlane.f32.xlu0 %v802_v15 }
 0x241   : > { %v849_v17 = vmul.f32 %v1305_v2, %v848_v16  ;;  %v838_v16 = vstv %s1167_s26 }
 0x243   : > { %v850_v18 = vsel %vm747_vm7, %v849_v17, 0.0 }
 0x244   : > { %v872_v19 = vpop.xlane.xlu1 %871  ;;  %851 = vadd.xlane.f32.xlu0 %v850_v18 }
 0x245   : > { %v888_v20 = vmul.f32 %v1307_v6, %v872_v19 }
 0x247   : > { %v889_v21 = vsel %vm747_vm7, %v888_v20, 0.0 }
 0x248   : > { %890 = vadd.xlane.f32.xlu0 %v889_v21  ;;  %v768_v22 = vpop.xlane.xlu1 %767  ;;  %v862_v21 = vstv %s1168_s23 }
 0x249   : > { %v769_v24 = vrot.slane %v768_v22, 4 }
 0x24b   : > { %v770_v27 = vadd.f32 %v769_v24, %v768_v22  ;;  %v886_v24 = vstv %s1819_s15 }
 0x24c   : > { %v828_v23 = vpop.xlane.xlu1 %827 }
 0x24d   : > { %v829_v25 = vrot.slane %v828_v23, 4  ;;  %v771_v30 = vrot.slane %v770_v27, 2 }
 0x24f   : > { %v830_v28 = vadd.f32 %v829_v25, %v828_v23  ;;  %v772_v37 = vadd.f32 %v771_v30, %v770_v27 }
 0x250   : > { %v876_v26 = vpop.xlane.xlu1 %875 }
 0x251   : > { %v877_v29 = vrot.slane %v876_v26, 4  ;;  %v831_v33 = vrot.slane %v830_v28, 2  ;;  %v773_v44 = vrot.slane %v772_v37, 1 }
 0x253   : > { %v878_v34 = vadd.f32 %v877_v29, %v876_v26  ;;  %v832_v41 = vadd.f32 %v831_v33, %v830_v28  ;;  %v774_v55 = vadd.f32 %v773_v44, %v772_v37  ;;  %v784_v33 = vstv %s1165_s16 }
 0x255   : > { %v879_v40 = vrot.slane %v878_v34, 2  ;;  %v833_v52 = vrot.slane %v832_v41, 1 }
 0x257   : > { %v880_v51 = vadd.f32 %v879_v40, %v878_v34  ;;  %v834_v45 = vadd.f32 %v833_v52, %v832_v41 }
 0x259   : > { %v881_v60 = vrot.slane %v880_v51, 1 }
 0x25b   : > { %v882_v2 = vadd.f32 %v881_v60, %v880_v51 }
 0x2c9   : > { %v750_v31 = vpop.xlane.xlu0 %749 }
 0x2ca   : > { %v751_v32 = vrot.slane %v750_v31, 4 }
 0x2cc   : > { %v752_v35 = vadd.f32 %v751_v32, %v750_v31 }
 0x2cd   : > { %v804_v36 = vpop.xlane.xlu0 %803 }
 0x2ce   : > { %v753_v38 = vrot.slane %v752_v35, 2  ;;  %v805_v39 = vrot.slane %v804_v36, 4 }
 0x2d0   : > { %v806_v42 = vadd.f32 %v805_v39, %v804_v36  ;;  %v754_v43 = vadd.f32 %v753_v38, %v752_v35 }
 0x2d1   : > { %v852_v46 = vpop.xlane.xlu0 %851 }
 0x2d2   : > { %v807_v48 = vrot.slane %v806_v42, 2  ;;  %v755_v49 = vrot.slane %v754_v43, 1  ;;  %v853_v50 = vrot.slane %v852_v46, 4 }
 0x2d4   : > { %v756_v53 = vadd.f32 %v755_v49, %v754_v43  ;;  %v854_v54 = vadd.f32 %v853_v50, %v852_v46  ;;  %v808_v47 = vadd.f32 %v807_v48, %v806_v42 }
 0x2d5   : > { %v891_v56 = vpop.xlane.xlu0 %890 }
 0x2d6   : > { %1194 = vpush %v756_v53  ;;  %v855_v57 = vrot.slane %v854_v54, 2  ;;  %v892_v58 = vrot.slane %v891_v56, 4  ;;  %v809_v59 = vrot.slane %v808_v47, 1 }
 0x2d7   : > { %1196 = vpush %v774_v55 }
 0x2d8   : > { %v893_v61 = vadd.f32 %v892_v58, %v891_v56  ;;  %v810_v62 = vadd.f32 %v809_v59, %v808_v47  ;;  %v856_v63 = vadd.f32 %v855_v57, %v854_v54 }
 0x2da   : > { %v894_v0 = vrot.slane %v893_v61, 2  ;;  %1198 = vpush %v810_v62  ;;  %v857_v1 = vrot.slane %v856_v63, 1 }
 0x2db   : > { %1200 = vpush %v834_v45 }
 0x2dc   : > { %v895_v3 = vadd.f32 %v894_v0, %v893_v61  ;;  %v858_v4 = vadd.f32 %v857_v1, %v856_v63 }
 0x2de   : > { %1202 = vpush %v858_v4  ;;  %v896_v5 = vrot.slane %v895_v3, 1 }
 0x2df   : > { %1204 = vpush %v882_v2 }
 0x2e0   : > { %v897_v6 = vadd.f32 %v896_v5, %v895_v3 }
 0x2e2   : > { %1206 = vpush %v897_v6 }
 0x307   : > { %s1195_s27 = spop %1194 }
 0x308   : > { %v758_v7 = vstv %s1195_s27  ;;  %s1197_s28 = spop %1196 }
 0x309   : > { %v760_v9 = vmul.f32 0.5, %v758_v7  ;;  %v776_v10 = vstv %s1197_s28 }
 0x30a   : > { %1308 = vrsqrt.f32 %v776_v10  ;;  %vm779_vm9 = vcmp.eq.f32.partialorder %v776_v10, inf  ;;  %v782_v32 = vand.u32 2147483648, %v776_v10  ;;  %vm781_vm10 = vcmp.eq.f32.partialorder %v776_v10, 0.0 }
 0x30b   : > { %v762_v11 = vmul.f32 %v761_v8, %v760_v9  ;;  %s1199_s25 = spop %1198 }
 0x30c   : > { %v812_v12 = vstv %s1199_s25  ;;  %s1201_s13 = spop %1200 }
 0x30d   : > { %910 = vst.msk [vmem:[#allocation10] sm:$0x1] %vm908_vm8, %v762_v11  ;;  %v813_v14 = vmul.f32 0.5, %v812_v12  ;;  %v836_v15 = vstv %s1201_s13 }
 0x30e   : > { %v837_v17 = vmul.f32 0.5, %v836_v15 }
 0x30f   : > { %v815_v18 = vmul.f32 %v814_v13, %v813_v14  ;;  %s1203_s21 = spop %1202 }
 0x310   : > { %v839_v19 = vmul.f32 %v838_v16, %v837_v17  ;;  %v860_v20 = vstv %s1203_s21  ;;  %s1205_s29 = spop %1204 }
 0x311   : > { %912 = vst.msk [vmem:[#allocation13] sm:$0x1] %vm908_vm8, %v815_v18  ;;  %v861_v22 = vmul.f32 0.5, %v860_v20  ;;  %v884_v23 = vstv %s1205_s29 }
 0x312   : > { %913 = vst.msk [vmem:[#allocation15] sm:$0x1] %vm908_vm8, %v839_v19  ;;  %v885_v25 = vmul.f32 0.5, %v884_v23 }
 0x313   : > { %v863_v26 = vmul.f32 %v862_v21, %v861_v22  ;;  %s1207_s30 = spop %1206 }
 0x314   : > { %v1309_v27 = vpop.eup %1308  ;;  %v887_v28 = vmul.f32 %v886_v24, %v885_v25  ;;  %v899_v29 = vstv %s1207_s30 }
 0x315   : > { %v778_v30 = vmul.f32 %v1309_v27, %v776_v10  ;;  %914 = vst.msk [vmem:[#allocation16] sm:$0x1] %vm908_vm8, %v863_v26  ;;  %v900_v31 = vmul.f32 0.5, %v899_v29 }
 0x316   : > { %915 = vst.msk [vmem:[#allocation18] sm:$0x1] %vm908_vm8, %v887_v28 }
 0x317   : > { %v780_v34 = vsel %vm779_vm9, %v776_v10, %v778_v30  ;;  %v901_v35 = vmul.f32 %v900_v31, %v886_v24 }
 0x318   : > { %v783_v36 = vsel %vm781_vm10, %v782_v32, %v780_v34 }
 0x319   : > { %v785_v37 = vmul.f32 %v784_v33, %v783_v36  ;;  %916 = vst.msk [vmem:[#allocation19] sm:$0x1] %vm908_vm8, %v901_v35 }
 0x31b   : > { %v902_v38 = vadd.f32 %v785_v37, %v762_v11  ;;  %911 = vst.msk [vmem:[#allocation12] sm:$0x1] %vm908_vm8, %v785_v37 }
 0x31d   : > { %v903_v39 = vadd.f32 %v902_v38, %v815_v18 }
 0x31f   : > { %v904_v40 = vadd.f32 %v903_v39, %v839_v19 }
 0x321   : > { %v905_v41 = vadd.f32 %v904_v40, %v863_v26 }
 0x323   : > { %v906_v42 = vadd.f32 %v905_v41, %v887_v28 }
 0x325   : > { %v907_v43 = vadd.f32 %v906_v42, %v901_v35 }
 0x327   : > { %909 = vst.msk [vmem:[#allocation9] sm:$0x1] %vm908_vm8, %v907_v43 }
 0x328 PF: > { %p1250_p8 = scmp.eq.s32.totalorder %s1692_s24, 1  ;;  %s1583_s0 = smov [#allocation10]  }
 0x329   : > { %s935_s17 = sshll.u32 %s1583_s0, 4  ;;  %s1584_s18 = smov [#allocation13]   ;;  %s936_s17 = int_to_ptr.vmem [resolvable:$true] %s935_s17 }
 0x32a   : > { %s957_s20 = sshll.u32 %s1584_s18, 4  ;;  %s1325_s19 = scalar_lea.vmem %s936_s17, 16  ;;  %s958_s20 = int_to_ptr.vmem [resolvable:$true] %s957_s20 }
 0x32b   : > { %p1326_p9 = scmp.ne.s32.totalorder %s936_s17, %s1325_s19  ;;  %s1331_s26 = scalar_lea.vmem %s936_s17, 32 }
 0x32c   : > { %p1332_p12 = scmp.lt.s32.totalorder %s936_s17, %s936_s17  ;;  %p1333_p13 = scmp.lt.s32.totalorder %s1331_s26, %s1325_s19 }
 0x32d   : > { %p1327_p10 = pnand %p1326_p9, %p1250_p8 }
 0x32e   : > { %p1334_p0 = por %p1333_p13, %p1332_p12 }
 0x32f   : > { %p1328_p11 = pneg %p1327_p10 }
 0x331   : > { %p1335_p1 = pnand %p1334_p0, %p1328_p11 }
 0x333   : > { %1338 = shalt.err (!%p1335_p1)
}
 0x334   : > { %s1339_s23 = scalar_lea.hbm %s2015_s10, 16 }
 0x335   : > { %p1340_p2 = scmp.ne.s32.totalorder %s2015_s10, %s1339_s23  ;;  %p1345_p4 = scmp.lt.u32.totalorder %s1339_s23, %s2015_s10 }
 0x337   : > { %p1341_p3 = pnand %p1340_p2, %p1250_p8 }
 0x339   : > { %p1342_p5 = pneg %p1341_p3 }
 0x33b   : > { %p1347_p6 = pnand %p1345_p4, %p1342_p5 }
 0x33d   : > { %1350 = shalt.err (!%p1347_p6)
}
 0x33e   : > { %1215 = dma.vmem_to_hbm [thread:$0]  (%p1250_p8), %s936_s17, 16, %s2015_s10, [#allocation11]  }
 0x33f   : > { %s1351_s30 = scalar_lea.vmem %s958_s20, 16  ;;  %s1357_s0 = scalar_lea.vmem %s958_s20, 32 }
 0x340   : > { %p1352_p7 = scmp.ne.s32.totalorder %s958_s20, %s1351_s30  ;;  %p1358_p11 = scmp.lt.s32.totalorder %s958_s20, %s958_s20 }
 0x341   : > { %p1359_p12 = scmp.lt.s32.totalorder %s1357_s0, %s1351_s30 }
 0x342   : > { %p1353_p9 = pnand %p1352_p7, %p1250_p8 }
 0x343   : > { %p1360_p13 = por %p1359_p12, %p1358_p11 }
 0x344   : > { %p1354_p10 = pneg %p1353_p9 }
 0x346   : > { %p1361_p0 = pnand %p1360_p13, %p1354_p10 }
 0x348   : > { %1364 = shalt.err (!%p1361_p0)
}
 0x349   : > { %s1365_s26 = scalar_lea.hbm %s2017_s12, 16 }
 0x34a   : > { %p1366_p1 = scmp.ne.s32.totalorder %s2017_s12, %s1365_s26  ;;  %p1371_p5 = scmp.lt.u32.totalorder %s1365_s26, %s2017_s12 }
 0x34c   : > { %p1367_p2 = pnand %p1366_p1, %p1250_p8 }
 0x34e   : > { %p1368_p3 = pneg %p1367_p2 }
 0x350   : > { %p1373_p4 = pnand %p1371_p5, %p1368_p3 }
 0x352   : > { %1376 = shalt.err (!%p1373_p4)
}
 0x353   : > { %1219 = dma.vmem_to_hbm [thread:$0]  (%p1250_p8), %s958_s20, 16, %s2017_s12, [#allocation14]  }
 0x354   : > { %s1585_s13 = smov [#allocation16]   ;;  %s1586_s21 = smov [#allocation9]  }
 0x355   : > { %s979_s16 = sshll.u32 %s1585_s13, 4  ;;  %s924_s29 = sshll.u32 %s1586_s21, 4  ;;  %s980_s16 = int_to_ptr.vmem [resolvable:$true] %s979_s16  ;;  %s925_s29 = int_to_ptr.vmem [resolvable:$true] %s924_s29 }
 0x356   : > { %s1377_s30 = scalar_lea.vmem %s980_s16, 16  ;;  %s1383_s0 = scalar_lea.vmem %s980_s16, 32 }
 0x357   : > { %p1378_p6 = scmp.ne.s32.totalorder %s980_s16, %s1377_s30  ;;  %p1384_p10 = scmp.lt.s32.totalorder %s980_s16, %s980_s16 }
 0x358   : > { %p1385_p11 = scmp.lt.s32.totalorder %s1383_s0, %s1377_s30 }
 0x359   : > { %p1379_p7 = pnand %p1378_p6, %p1250_p8 }
 0x35a   : > { %p1386_p12 = por %p1385_p11, %p1384_p10 }
 0x35b   : > { %p1380_p9 = pneg %p1379_p7 }
 0x35d   : > { %p1387_p13 = pnand %p1386_p12, %p1380_p9 }
 0x35f   : > { %1390 = shalt.err (!%p1387_p13)
}
 0x360   : > { %s1391_s20 = scalar_lea.hbm %s2019_s14, 16 }
 0x361   : > { %p1392_p0 = scmp.ne.s32.totalorder %s2019_s14, %s1391_s20  ;;  %p1397_p3 = scmp.lt.u32.totalorder %s1391_s20, %s2019_s14 }
 0x363   : > { %p1393_p1 = pnand %p1392_p0, %p1250_p8 }
 0x365   : > { %p1394_p2 = pneg %p1393_p1 }
 0x367   : > { %p1399_p5 = pnand %p1397_p3, %p1394_p2 }
 0x369   : > { %1402 = shalt.err (!%p1399_p5)
}
 0x36a   : > { %1223 = dma.vmem_to_hbm [thread:$0]  (%p1250_p8), %s980_s16, 16, %s2019_s14, [#allocation17]  }
 0x36b   : > { %s1403_s25 = scalar_lea.vmem %s925_s29, 16  ;;  %s1409_s13 = scalar_lea.vmem %s925_s29, 32 }
 0x36c   : > { %p1404_p4 = scmp.ne.s32.totalorder %s925_s29, %s1403_s25  ;;  %p1410_p9 = scmp.lt.s32.totalorder %s925_s29, %s925_s29 }
 0x36d   : > { %p1411_p10 = scmp.lt.s32.totalorder %s1409_s13, %s1403_s25 }
 0x36e   : > { %p1405_p6 = pnand %p1404_p4, %p1250_p8 }
 0x36f   : > { %p1412_p11 = por %p1411_p10, %p1410_p9 }
 0x370   : > { %p1406_p7 = pneg %p1405_p6 }
 0x372   : > { %p1413_p12 = pnand %p1412_p11, %p1406_p7 }
 0x374   : > { %1416 = shalt.err (!%p1413_p12)
}
 0x375   : > { %s1417_s0 = scalar_lea.hbm %s2014_s9, 16 }
 0x376   : > { %p1418_p13 = scmp.ne.s32.totalorder %s2014_s9, %s1417_s0  ;;  %p1423_p2 = scmp.lt.u32.totalorder %s1417_s0, %s2014_s9 }
 0x378   : > { %p1419_p0 = pnand %p1418_p13, %p1250_p8 }
 0x37a   : > { %p1420_p1 = pneg %p1419_p0 }
 0x37c   : > { %p1425_p3 = pnand %p1423_p2, %p1420_p1 }
 0x37e   : > { %1428 = shalt.err (!%p1425_p3)
}
 0x37f   : > { %1213 = dma.vmem_to_hbm [thread:$0]  (%p1250_p8), %s925_s29, 16, %s2014_s9, [#allocation5]  }
 0x380   : > { %s1587_s28 = smov [#allocation12]   ;;  %s1588_s23 = smov [#allocation15]  }
 0x381   : > { %s946_s17 = sshll.u32 %s1587_s28, 4  ;;  %s968_s15 = sshll.u32 %s1588_s23, 4  ;;  %s947_s17 = int_to_ptr.vmem [resolvable:$true] %s946_s17  ;;  %s969_s15 = int_to_ptr.vmem [resolvable:$true] %s968_s15 }
 0x382   : > { %s1429_s25 = scalar_lea.vmem %s947_s17, 16  ;;  %s1435_s13 = scalar_lea.vmem %s947_s17, 32 }
 0x383   : > { %p1430_p5 = scmp.ne.s32.totalorder %s947_s17, %s1429_s25  ;;  %p1436_p7 = scmp.lt.s32.totalorder %s947_s17, %s947_s17 }
 0x384   : > { %p1437_p9 = scmp.lt.s32.totalorder %s1435_s13, %s1429_s25 }
 0x385   : > { %p1431_p4 = pnand %p1430_p5, %p1250_p8 }
 0x386   : > { %p1438_p10 = por %p1437_p9, %p1436_p7 }
 0x387   : > { %p1432_p6 = pneg %p1431_p4 }
 0x389   : > { %p1439_p11 = pnand %p1438_p10, %p1432_p6 }
 0x38b   : > { %1442 = shalt.err (!%p1439_p11)
}
 0x38c   : > { %s1443_s29 = scalar_lea.hbm %s2016_s11, 16 }
 0x38d   : > { %p1444_p12 = scmp.ne.s32.totalorder %s2016_s11, %s1443_s29  ;;  %p1449_p1 = scmp.lt.u32.totalorder %s1443_s29, %s2016_s11 }
 0x38f   : > { %p1445_p13 = pnand %p1444_p12, %p1250_p8 }
 0x391   : > { %p1446_p0 = pneg %p1445_p13 }
 0x393   : > { %p1451_p2 = pnand %p1449_p1, %p1446_p0 }
 0x395   : > { %1454 = shalt.err (!%p1451_p2)
}
 0x396   : > { %1217 = dma.vmem_to_hbm [thread:$0]  (%p1250_p8), %s947_s17, 16, %s2016_s11, [#allocation11]  }
 0x397   : > { %s1455_s27 = scalar_lea.vmem %s969_s15, 16  ;;  %s1461_s28 = scalar_lea.vmem %s969_s15, 32 }
 0x398   : > { %p1456_p3 = scmp.ne.s32.totalorder %s969_s15, %s1455_s27  ;;  %p1462_p6 = scmp.lt.s32.totalorder %s969_s15, %s969_s15 }
 0x399   : > { %p1463_p7 = scmp.lt.s32.totalorder %s1461_s28, %s1455_s27 }
 0x39a   : > { %p1457_p5 = pnand %p1456_p3, %p1250_p8 }
 0x39b   : > { %p1464_p9 = por %p1463_p7, %p1462_p6 }
 0x39c   : > { %p1458_p4 = pneg %p1457_p5 }
 0x39e   : > { %p1465_p10 = pnand %p1464_p9, %p1458_p4 }
 0x3a0   : > { %1468 = shalt.err (!%p1465_p10)
}
 0x3a1   : > { %s2037_s13 = sld [smem:[#allocation30_spill]] }
 0x3a7   : > { %s1469_s21 = scalar_lea.hbm %s2037_s13, 16 }
 0x3a8   : > { %p1470_p11 = scmp.ne.s32.totalorder %s2037_s13, %s1469_s21  ;;  %p1475_p0 = scmp.lt.u32.totalorder %s1469_s21, %s2037_s13 }
 0x3aa   : > { %p1471_p12 = pnand %p1470_p11, %p1250_p8 }
 0x3ac   : > { %p1472_p13 = pneg %p1471_p12 }
 0x3ae   : > { %p1477_p1 = pnand %p1475_p0, %p1472_p13 }
 0x3b0   : > { %1480 = shalt.err (!%p1477_p1)
}
 0x3b1   : > { %1221 = dma.vmem_to_hbm [thread:$0]  (%p1250_p8), %s969_s15, 16, %s2037_s13, [#allocation14]  }
 0x3b2   : > { %s1589_s16 = smov [#allocation18]   ;;  %s1590_s26 = smov [#allocation19]  }
 0x3b3   : > { %s990_s20 = sshll.u32 %s1589_s16, 4  ;;  %s1001_s27 = sshll.u32 %s1590_s26, 4  ;;  %s991_s20 = int_to_ptr.vmem [resolvable:$true] %s990_s20  ;;  %s1002_s27 = int_to_ptr.vmem [resolvable:$true] %s1001_s27 }
 0x3b4   : > { %s1481_s28 = scalar_lea.vmem %s991_s20, 16  ;;  %s1487_s23 = scalar_lea.vmem %s991_s20, 32 }
 0x3b5   : > { %p1482_p2 = scmp.ne.s32.totalorder %s991_s20, %s1481_s28  ;;  %p1488_p4 = scmp.lt.s32.totalorder %s991_s20, %s991_s20 }
 0x3b6   : > { %p1489_p6 = scmp.lt.s32.totalorder %s1487_s23, %s1481_s28 }
 0x3b7   : > { %p1483_p3 = pnand %p1482_p2, %p1250_p8 }
 0x3b8   : > { %p1490_p7 = por %p1489_p6, %p1488_p4 }
 0x3b9   : > { %p1484_p5 = pneg %p1483_p3 }
 0x3bb   : > { %p1491_p9 = pnand %p1490_p7, %p1484_p5 }
 0x3bd   : > { %1494 = shalt.err (!%p1491_p9)
}
 0x3be   : > { %s2038_s30 = sld [smem:[#allocation31_spill]] }
 0x3c4   : > { %s1495_s15 = scalar_lea.hbm %s2038_s30, 16 }
 0x3c5   : > { %p1496_p10 = scmp.ne.s32.totalorder %s2038_s30, %s1495_s15  ;;  %p1501_p13 = scmp.lt.u32.totalorder %s1495_s15, %s2038_s30 }
 0x3c7   : > { %p1497_p11 = pnand %p1496_p10, %p1250_p8 }
 0x3c9   : > { %p1498_p12 = pneg %p1497_p11 }
 0x3cb   : > { %p1503_p0 = pnand %p1501_p13, %p1498_p12 }
 0x3cd   : > { %1506 = shalt.err (!%p1503_p0)
}
 0x3ce   : > { %1225 = dma.vmem_to_hbm [thread:$0]  (%p1250_p8), %s991_s20, 16, %s2038_s30, [#allocation17]  }
 0x3cf   : > { %s1507_s26 = scalar_lea.vmem %s1002_s27, 16  ;;  %s1513_s28 = scalar_lea.vmem %s1002_s27, 32 }
 0x3d0   : > { %p1508_p1 = scmp.ne.s32.totalorder %s1002_s27, %s1507_s26  ;;  %p1514_p5 = scmp.lt.s32.totalorder %s1002_s27, %s1002_s27 }
 0x3d1   : > { %p1515_p4 = scmp.lt.s32.totalorder %s1513_s28, %s1507_s26 }
 0x3d2   : > { %p1509_p2 = pnand %p1508_p1, %p1250_p8 }
 0x3d3   : > { %p1516_p6 = por %p1515_p4, %p1514_p5 }
 0x3d4   : > { %p1510_p3 = pneg %p1509_p2 }
 0x3d6   : > { %p1517_p7 = pnand %p1516_p6, %p1510_p3 }
 0x3d8   : > { %1520 = shalt.err (!%p1517_p7)
}
 0x3d9   : > { %s2039_s21 = sld [smem:[#allocation32_spill]] }
 0x3df   : > { %s2040_s15 = smov %s2039_s21  ;;  %s1521_s29 = scalar_lea.hbm %s2039_s21, 16 }
 0x3e0   : > { %p1522_p9 = scmp.ne.s32.totalorder %s2040_s15, %s1521_s29  ;;  %p1527_p12 = scmp.lt.u32.totalorder %s1521_s29, %s2040_s15 }
 0x3e2   : > { %p1523_p10 = pnand %p1522_p9, %p1250_p8 }
 0x3e4   : > { %p1524_p11 = pneg %p1523_p10 }
 0x3e6   : > { %p1529_p13 = pnand %p1527_p12, %p1524_p11 }
 0x3e8   : > { %1532 = shalt.err (!%p1529_p13)
}
 0x3e9   : > { %1227 = dma.vmem_to_hbm [thread:$0]  (%p1250_p8), %s1002_s27, 16, %s2040_s15, [#allocation20]  }
 0x3ea   : > { %1550 = dma.done.wait (%p1250_p8), [#allocation5], 16  }
 0x3eb   : > { %1552 = vsyncadd (%p1250_p8), [#allocation5], 4294967280 }
 0x3ec   : > { %1554 = dma.done.wait (%p1250_p8), [#allocation11], 32  }
 0x3ed   : > { %1556 = vsyncadd (%p1250_p8), [#allocation11], 4294967264 }
 0x3ee   : > { %1558 = dma.done.wait (%p1250_p8), [#allocation14], 32  }
 0x3ef   : > { %1560 = vsyncadd (%p1250_p8), [#allocation14], 4294967264 }
 0x3f0   : > { %1562 = dma.done.wait (%p1250_p8), [#allocation17], 32  }
 0x3f1   : > { %1564 = vsyncadd (%p1250_p8), [#allocation17], 4294967264 }
 0x3f2   : > { %1566 = dma.done.wait (%p1250_p8), [#allocation20], 16  }
 0x3f3   : > { %1568 = vsyncadd (%p1250_p8), [#allocation20], 4294967280 }
 0x3f4 PF: > { %s2041_s23 = sld [smem:[#allocation27_spill]]  ;;  %s2042_s27 = sld [smem:[#allocation28_spill]] }
 0x3f5   : > { %s2043_s21 = smov %s1575_s22 }
 0x3fa   : > { %p30_p0 = scmp.ge.s32.totalorder %s2041_s23, 4   ;;  %s2044_s22 = smov %s2042_s27 }
 0x3fc   :  { %32 = sbr.rel (!%p30_p0) target bundleno = 12 (0xc), region = 250 }
 0x403   :  { %1042 = vsyncpa [#allocation5], 1 }
 0x404   :  { %1044 = vsyncpa [#allocation5 + $0x1], 1 }
 0x405   :  { %1045 = vsyncpa [#allocation11], 1 }
 0x406   :  { %1046 = vsyncpa [#allocation14], 1 }
 0x407   :  { %1047 = vsyncpa [#allocation17], 1 }
 0x408   :  { %1048 = vsyncpa [#allocation20], 1 }
 0x409   :  { %1049 = vsyncpa [#allocation6], 1 }
 0x40a   :  { %1051 = vsyncpa [#allocation6 + $0x1], 1 }

</bundles_post_ra>
